<compile_context>
chip_gen: v7x
topology: tpu7x:2x2x1
jax: 0.10.0
libtpu: 0.0.40
codegen_flags: <defaults>
</compile_context>

<pallas_src>
import functools
import math

import jax
import jax.numpy as jnp
from jax.experimental import pallas as pl
from jax.experimental.pallas import tpu as pltpu


# =============================================================================
# Pallas kernel: one encoder layer, one (batch, query-block) grid cell.
# =============================================================================
def _encoder_layer_kernel(
    x_ref, mask_ref,
    wq_ref, bq_ref, wkv_ref, bkv_ref, wo_ref, bo_ref,
    ln1_g_ref, ln1_b_ref,
    w1_ref, b1_ref, w2_ref, b2_ref,
    ln2_g_ref, ln2_b_ref,
    out_ref,
    k_sc, v_sc, acc_sc,
    *, n_heads: int, ff_chunk: int,
):
    f32 = jnp.float32
    bf16 = jnp.bfloat16

    qi = pl.program_id(1)
    S, D = x_ref.shape[1], x_ref.shape[2]
    TQ = acc_sc.shape[0]
    hd = D // n_heads
    scale = 1.0 / (hd ** 0.5)

    def layer_norm(v, g_ref, b_ref):
        # statistics in f32
        mu = jnp.mean(v, axis=-1, keepdims=True)
        var = jnp.mean((v - mu) ** 2, axis=-1, keepdims=True)
        return (v - mu) * jax.lax.rsqrt(var + 1e-5) * g_ref[...] + b_ref[...]

    # --- K/V projection: computed once per batch (qi == 0), cached in bf16
    #     VMEM scratch, reused for every query block of that batch. ----------
    @pl.when(qi == 0)
    def _():
        x_kv = x_ref[0]                                           # (S, D) bf16
        kv = jnp.dot(x_kv, wkv_ref[...],
                     preferred_element_type=f32) + bkv_ref[...]   # (S, 2D) f32
        k_sc[...] = kv[:, :D].astype(bf16)
        v_sc[...] = kv[:, D:].astype(bf16)

    # --- query rows for this block (bf16 stream; residual upcast to f32) ----
    q_start = pl.multiple_of(qi * TQ, TQ)
    x_q = x_ref[0, pl.ds(q_start, TQ), :]                         # (TQ, D) bf16
    x_res = x_q.astype(f32)

    mask = mask_ref[0]                                            # (1, S) f32
    neg_bias = (mask - 1.0) * 1e9          # 0 where attend, -1e9 where masked

    # Q projection; 1/sqrt(hd) folded into q (one (TQ,D) scale instead of a
    # (TQ,S) scale per head).
    q = (jnp.dot(x_q, wq_ref[...], preferred_element_type=f32)
         + bq_ref[...]) * scale
    q_b = q.astype(bf16)

    # --- attention: per-head scores/softmax; output projection decomposed
    #     per head so accumulation into acc_sc is always lane-dense (no
    #     masked stores when head_dim < 128). --------------------------------
    acc_sc[...] = jnp.zeros_like(acc_sc)
    for h in range(n_heads):          # TODO(synk): lax.fori_loop for n_heads>=16
        lo = h * hd
        qh = q_b[:, lo:lo + hd]                                   # (TQ, hd)
        kh = k_sc[:, lo:lo + hd]                                  # (S,  hd)
        vh = v_sc[:, lo:lo + hd]                                  # (S,  hd)

        # contract head_dim of both operands: no explicit XLU transpose.
        s = jax.lax.dot_general(qh, kh, (((1,), (1,)), ((), ())),
                                preferred_element_type=f32)       # (TQ, S)
        s = s + neg_bias
        s = s - jnp.max(s, axis=-1, keepdims=True)
        p = jnp.exp(s)
        denom = jnp.sum(p, axis=-1, keepdims=True)                # (TQ, 1)

        ctx = jnp.dot(p.astype(bf16), vh,
                      preferred_element_type=f32)                 # (TQ, hd)
        # deferred softmax normalization: scale the small context, not p.
        ctx = ctx * pl.reciprocal(denom, approx=True)
        acc_sc[...] += jnp.dot(ctx.astype(bf16), wo_ref[lo:lo + hd, :],
                               preferred_element_type=f32)        # (TQ, D)

    attn = acc_sc[...] + bo_ref[...]
    y1 = layer_norm(x_res + attn, ln1_g_ref, ln1_b_ref)
    y1_b = y1.astype(bf16)

    # --- FFN: hidden dim chunked + ReLU fused; partial sums accumulated in
    #     the (TQ, D) f32 VMEM scratch (no big live accumulator to spill). ---
    hidden = w1_ref.shape[1]
    acc_sc[...] = jnp.zeros_like(acc_sc)
    for c0 in range(0, hidden, ff_chunk):
        h1c = (jnp.dot(y1_b, w1_ref[:, c0:c0 + ff_chunk],
                       preferred_element_type=f32)
               + b1_ref[:, c0:c0 + ff_chunk])
        h1c = jnp.maximum(h1c, 0.0).astype(bf16)
        acc_sc[...] += jnp.dot(h1c, w2_ref[c0:c0 + ff_chunk, :],
                               preferred_element_type=f32)
    h2 = acc_sc[...] + b2_ref[...]

    y2 = layer_norm(y1 + h2, ln2_g_ref, ln2_b_ref)
    out_ref[0] = y2.astype(out_ref.dtype)


# -----------------------------------------------------------------------------
# VMEM budget (shape-derived, per-generation capped).
# -----------------------------------------------------------------------------
def _vmem_cap_bytes():
    try:
        cap = getattr(pltpu.get_tpu_info(), "vmem_capacity_bytes", None)
        if cap:
            return int(cap)
    except Exception:
        pass
    return 64 * 1024 * 1024     # conservative default (v7x per-TC VMEM)


def _vmem_limit_bytes(weights, S, D, q_block, w_buffers):
    wb = sum(math.prod(w.shape) * w.dtype.itemsize for w in weights) * w_buffers
    io = 2 * (S * D * 2)            # x block (bf16), double-buffered
    io += 2 * (q_block * D * 2)     # out block (bf16), double-buffered
    io += 2 * (S * 4)               # mask block (f32), double-buffered
    sc = 2 * (S * D * 2) + q_block * D * 4   # K/V bf16 caches + f32 accumulator
    budget = int(1.3 * (wb + io + sc)) + (4 << 20)   # headroom for intermediates
    return min(max(budget, 32 << 20), _vmem_cap_bytes())


# -----------------------------------------------------------------------------
# One encoder layer. x: (B, S, D) bf16 activation stream, mask: (B, 1, S) f32.
# Returns (B, S, D) bf16.
# -----------------------------------------------------------------------------
def encoder_layer(x, mask, params, *, n_heads):
    B, S, D = x.shape
    assert D % n_heads == 0, "d_model must be divisible by n_heads"
    x = x.astype(jnp.bfloat16)

    # TODO(synk): on v6e (128 MiB VMEM) q_block=256 amortizes per-step
    # overhead better when S % 256 == 0; kept at 128 for the v7x budget.
    q_block = 128 if S % 128 == 0 else S
    n_q = S // q_block

    hidden = params["w1"].shape[1]
    ff_chunk = 512 if hidden % 512 == 0 else hidden

    bf16 = jnp.bfloat16
    # Matmul weights in bf16; biases / LN params stay f32. K|V weights fused.
    weights = [
        params["wq"].astype(bf16), params["bq"],
        jnp.concatenate([params["wk"], params["wv"]], axis=1).astype(bf16),
        jnp.concatenate([params["bk"], params["bv"]], axis=1),
        params["wo"].astype(bf16), params["bo"],
        params["ln1_g"], params["ln1_b"],
        params["w1"].astype(bf16), params["b1"],
        params["w2"].astype(bf16), params["b2"],
        params["ln2_g"], params["ln2_b"],
    ]

    kernel = functools.partial(_encoder_layer_kernel,
                               n_heads=n_heads, ff_chunk=ff_chunk)

    x_spec = pl.BlockSpec((1, S, D), lambda b, qi: (b, 0, 0))
    mask_spec = pl.BlockSpec((1, 1, S), lambda b, qi: (b, 0, 0))
    out_spec = pl.BlockSpec((1, q_block, D), lambda b, qi: (b, qi, 0))
    scratch = [
        pltpu.VMEM((S, D), bf16),                 # cached K projection
        pltpu.VMEM((S, D), bf16),                 # cached V projection
        pltpu.VMEM((q_block, D), jnp.float32),    # attention / FFN accumulator
    ]

    def build(single_buffer_weights):
        if single_buffer_weights:
            # constant block index -> double buffering buys nothing; halve VMEM.
            w_specs = [pl.BlockSpec(w.shape, lambda b, qi: (0, 0),
                                    pipeline_mode=pl.Buffered(1))
                       for w in weights]
            w_buffers = 1
        else:
            w_specs = [pl.BlockSpec(w.shape, lambda b, qi: (0, 0))
                       for w in weights]
            w_buffers = 2
        return pl.pallas_call(
            kernel,
            out_shape=jax.ShapeDtypeStruct((B, S, D), bf16),
            grid=(B, n_q),
            in_specs=[x_spec, mask_spec] + w_specs,
            out_specs=out_spec,
            scratch_shapes=scratch,
            compiler_params=pltpu.CompilerParams(
                # batch parallel (megacore); query blocks sequential so the
                # cached K/V scratch filled at qi==0 is valid for all blocks.
                # TODO(synk): for B == 1 on v7x, hoist the K/V projection out
                # of the kernel and mark both axes parallel instead.
                dimension_semantics=("parallel", "arbitrary"),
                vmem_limit_bytes=_vmem_limit_bytes(weights, S, D, q_block,
                                                   w_buffers)),
        )

    try:
        return build(True)(x, mask, *weights)
    except Exception:
        # pl.Buffered(1) (single-buffered constant weights) unsupported on
        # this jax build: fall back to default double-buffered weight specs.
        return build(False)(x, mask, *weights)


# -----------------------------------------------------------------------------
# Glue: embedding lookup + positional encoding (replicates the PyTorch formula
# exactly, including the use of the *full* dim index i in the exponent).
# -----------------------------------------------------------------------------
def positional_encoding(seq_len, d_model):
    pos = jnp.arange(seq_len, dtype=jnp.float32)[:, None]     # (S, 1)
    i = jnp.arange(d_model, dtype=jnp.float32)[None, :]       # (1, D)
    enc = pos / (10000.0 ** (2.0 * i / d_model))               # (S, D)
    even = (jnp.arange(d_model) % 2) == 0
    enc = jnp.where(even[None, :], jnp.sin(enc), jnp.cos(enc))
    return enc                                                 # (S, D)


def init_layer_params(key, size, hidden):
    ks = jax.random.split(key, 6)
    s = 0.02
    return {
        "wq": jax.random.normal(ks[0], (size, size), jnp.float32) * s,
        "bq": jnp.zeros((1, size), jnp.float32),
        "wk": jax.random.normal(ks[1], (size, size), jnp.float32) * s,
        "bk": jnp.zeros((1, size), jnp.float32),
        "wv": jax.random.normal(ks[2], (size, size), jnp.float32) * s,
        "bv": jnp.zeros((1, size), jnp.float32),
        "wo": jax.random.normal(ks[3], (size, size), jnp.float32) * s,
        "bo": jnp.zeros((1, size), jnp.float32),
        "ln1_g": jnp.ones((1, size), jnp.float32),
        "ln1_b": jnp.zeros((1, size), jnp.float32),
        "w1": jax.random.normal(ks[4], (size, hidden), jnp.float32) * s,
        "b1": jnp.zeros((1, hidden), jnp.float32),
        "w2": jax.random.normal(ks[5], (hidden, size), jnp.float32) * s,
        "b2": jnp.zeros((1, size), jnp.float32),
        "ln2_g": jnp.ones((1, size), jnp.float32),
        "ln2_b": jnp.zeros((1, size), jnp.float32),
    }


def encoder_forward(tokens, mask, emb_table, layer_params, *, n_heads):
    B, S = tokens.shape
    D = emb_table.shape[1]
    x = jnp.take(emb_table, tokens, axis=0)          # embedding lookup (glue)
    x = x + positional_encoding(S, D)[None]          # positional encoding
    # bf16 residual stream between layers halves inter-layer HBM traffic.
    x = x.astype(jnp.bfloat16)
    # TODO(synk): dropout is identity (inference mode); no Pallas RNG used.
    # TODO(synk): all n_layers could be fused in one pallas_call (weights
    # pipelined by a layer grid axis) to keep activations resident in VMEM.
    for p in layer_params:
        x = encoder_layer(x, mask, p, n_heads=n_heads)
    return x.astype(jnp.float32)


# -----------------------------------------------------------------------------
# Pure-JAX f32 reference (same math) for a numerical sanity check.
# -----------------------------------------------------------------------------
def _encoder_layer_ref(x, mask, p, *, n_heads):
    B, S, D = x.shape
    hd = D // n_heads

    def ln(v, g, b):
        mu = v.mean(-1, keepdims=True)
        var = ((v - mu) ** 2).mean(-1, keepdims=True)
        return (v - mu) / jnp.sqrt(var + 1e-5) * g + b

    q = x @ p["wq"] + p["bq"]
    k = x @ p["wk"] + p["bk"]
    v = x @ p["wv"] + p["bv"]
    qh = q.reshape(B, S, n_heads, hd).transpose(0, 2, 1, 3)
    kh = k.reshape(B, S, n_heads, hd).transpose(0, 2, 1, 3)
    vh = v.reshape(B, S, n_heads, hd).transpose(0, 2, 1, 3)
    s = jnp.einsum("bhqd,bhkd->bhqk", qh, kh) / (hd ** 0.5)
    s = s + (mask[:, None, :, :] - 1.0) * 1e9
    pm = jax.nn.softmax(s, axis=-1)
    ctx = jnp.einsum("bhqk,bhkd->bhqd", pm, vh)
    attn = ctx.transpose(0, 2, 1, 3).reshape(B, S, D) @ p["wo"] + p["bo"]
    y1 = ln(x + attn, p["ln1_g"], p["ln1_b"])
    h = jnp.maximum(y1 @ p["w1"] + p["b1"], 0.0)
    return ln(y1 + h @ p["w2"] + p["b2"], p["ln2_g"], p["ln2_b"])


def encoder_forward_ref(tokens, mask, emb_table, layer_params, *, n_heads):
    B, S = tokens.shape
    D = emb_table.shape[1]
    x = jnp.take(emb_table, tokens, axis=0) + positional_encoding(S, D)[None]
    for p in layer_params:
        x = _encoder_layer_ref(x, mask, p, n_heads=n_heads)
    return x


if __name__ == "__main__":
    # Small config consistent with Encoder(num_embeddings, size, n_layers,
    # n_heads, dropout).
    num_embeddings = 50
    size = 32            # d_model
    n_layers = 2
    n_heads = 4
    hidden = 4 * size    # FFN hidden dim
    B, S = 2, 8

    root = jax.random.PRNGKey(0)
    k_tok, k_emb, k_layers = jax.random.split(root, 3)

    tokens = jax.random.randint(k_tok, (B, S), 0, num_embeddings, dtype=jnp.int32)

    # mask: 1 = attend, 0 = masked; mask out last two key positions of batch 1.
    mask = jnp.ones((B, 1, S), jnp.float32)
    mask = mask.at[1, 0, 6:].set(0.0)

    emb_table = jax.random.normal(k_emb, (num_embeddings, size), jnp.float32) * 0.02
    layer_keys = jax.random.split(k_layers, n_layers)
    layer_params = [init_layer_params(k, size, hidden) for k in layer_keys]

    out = encoder_forward(tokens, mask, emb_table, layer_params, n_heads=n_heads)
    out = jax.block_until_ready(out)
    assert out.shape == (B, S, size) and out.dtype == jnp.float32
    assert bool(jnp.all(jnp.isfinite(out)))

    ref = encoder_forward_ref(tokens, mask, emb_table, layer_params,
                              n_heads=n_heads)
    ref = jax.block_until_ready(ref)
    # bf16 MXU path + bf16 residual stream vs f32 reference: loose bound
    # (layer outputs are LayerNorm outputs, O(1)).
    assert float(jnp.max(jnp.abs(out - ref))) < 0.3

    print("KERNEL_OK")
</pallas_src>

<mosaic_0001>
module attributes {stable_mosaic.version = 11 : i64} {
  func.func @_encoder_layer_kernel(%arg0: i32, %arg1: i32, %arg2: memref<1x8x32xbf16, #tpu.memory_space<vmem>>, %arg3: memref<1x1x8xf32, #tpu.memory_space<vmem>>, %arg4: memref<32x32xbf16, #tpu.memory_space<vmem>>, %arg5: memref<1x32xf32, #tpu.memory_space<vmem>>, %arg6: memref<32x64xbf16, #tpu.memory_space<vmem>>, %arg7: memref<1x64xf32, #tpu.memory_space<vmem>>, %arg8: memref<32x32xbf16, #tpu.memory_space<vmem>>, %arg9: memref<1x32xf32, #tpu.memory_space<vmem>>, %arg10: memref<1x32xf32, #tpu.memory_space<vmem>>, %arg11: memref<1x32xf32, #tpu.memory_space<vmem>>, %arg12: memref<32x128xbf16, #tpu.memory_space<vmem>>, %arg13: memref<1x128xf32, #tpu.memory_space<vmem>>, %arg14: memref<128x32xbf16, #tpu.memory_space<vmem>>, %arg15: memref<1x32xf32, #tpu.memory_space<vmem>>, %arg16: memref<1x32xf32, #tpu.memory_space<vmem>>, %arg17: memref<1x32xf32, #tpu.memory_space<vmem>>, %arg18: memref<1x8x32xbf16, #tpu.memory_space<vmem>>, %arg19: memref<8x32xbf16, #tpu.memory_space<vmem>>, %arg20: memref<8x32xbf16, #tpu.memory_space<vmem>>, %arg21: memref<8x32xf32, #tpu.memory_space<vmem>>) attributes {dimension_semantics = [#tpu.dimension_semantics<parallel>, #tpu.dimension_semantics<arbitrary>], iteration_bounds = array<i64: 2, 1>, scalar_prefetch = 0 : i64, scratch_operands = 3 : i64, tpu.core_type = #tpu.core_type<tc>, window_params = [{transform_indices = @transform_0, window_bounds = array<i64: 1, 8, 32>}, {transform_indices = @transform_1, window_bounds = array<i64: 1, 1, 8>}, {pipeline_mode = #tpu.pipeline_mode<synchronous>, transform_indices = @transform_2, window_bounds = array<i64: 32, 32>}, {pipeline_mode = #tpu.pipeline_mode<synchronous>, transform_indices = @transform_3, window_bounds = array<i64: 1, 32>}, {pipeline_mode = #tpu.pipeline_mode<synchronous>, transform_indices = @transform_4, window_bounds = array<i64: 32, 64>}, {pipeline_mode = #tpu.pipeline_mode<synchronous>, transform_indices = @transform_5, window_bounds = array<i64: 1, 64>}, {pipeline_mode = #tpu.pipeline_mode<synchronous>, transform_indices = @transform_6, window_bounds = array<i64: 32, 32>}, {pipeline_mode = #tpu.pipeline_mode<synchronous>, transform_indices = @transform_7, window_bounds = array<i64: 1, 32>}, {pipeline_mode = #tpu.pipeline_mode<synchronous>, transform_indices = @transform_8, window_bounds = array<i64: 1, 32>}, {pipeline_mode = #tpu.pipeline_mode<synchronous>, transform_indices = @transform_9, window_bounds = array<i64: 1, 32>}, {pipeline_mode = #tpu.pipeline_mode<synchronous>, transform_indices = @transform_10, window_bounds = array<i64: 32, 128>}, {pipeline_mode = #tpu.pipeline_mode<synchronous>, transform_indices = @transform_11, window_bounds = array<i64: 1, 128>}, {pipeline_mode = #tpu.pipeline_mode<synchronous>, transform_indices = @transform_12, window_bounds = array<i64: 128, 32>}, {pipeline_mode = #tpu.pipeline_mode<synchronous>, transform_indices = @transform_13, window_bounds = array<i64: 1, 32>}, {pipeline_mode = #tpu.pipeline_mode<synchronous>, transform_indices = @transform_14, window_bounds = array<i64: 1, 32>}, {pipeline_mode = #tpu.pipeline_mode<synchronous>, transform_indices = @transform_15, window_bounds = array<i64: 1, 32>}, {transform_indices = @transform_16, window_bounds = array<i64: 1, 8, 32>}]} {
    %c0_i32 = arith.constant 0 : i32
    %0 = arith.cmpi eq, %arg1, %c0_i32 : i32
    %1 = arith.extui %0 : i1 to i32
    %c0_i32_0 = arith.constant 0 : i32
    %2 = arith.cmpi ne, %1, %c0_i32_0 : i32
    scf.if %2 {
      %c0_117 = arith.constant 0 : index
      %c0_118 = arith.constant 0 : index
      %c0_119 = arith.constant 0 : index
      %199 = vector.load %arg2[%c0_117, %c0_118, %c0_119] : memref<1x8x32xbf16, #tpu.memory_space<vmem>>, vector<1x8x32xbf16>
      %200 = vector.shape_cast %199 : vector<1x8x32xbf16> to vector<8x32xbf16>
      %c0_120 = arith.constant 0 : index
      %c0_121 = arith.constant 0 : index
      %201 = vector.load %arg6[%c0_120, %c0_121] : memref<32x64xbf16, #tpu.memory_space<vmem>>, vector<32x64xbf16>
      %cst_122 = arith.constant dense<0.000000e+00> : vector<8x64xf32>
      %202 = tpu.matmul %200, %201, %cst_122 {dimension_numbers = #tpu.dot_dimension_numbers<[1], [0], [0], [1], [0, 0, 1, 1], [], []>} : vector<8x32xbf16>, vector<32x64xbf16>, vector<8x64xf32> -> vector<8x64xf32>
      %c0_123 = arith.constant 0 : index
      %c0_124 = arith.constant 0 : index
      %203 = vector.load %arg7[%c0_123, %c0_124] : memref<1x64xf32, #tpu.memory_space<vmem>>, vector<1x64xf32>
      %204 = vector.broadcast %203 : vector<1x64xf32> to vector<8x64xf32>
      %205 = arith.addf %202, %204 : vector<8x64xf32>
      %206 = vector.extract_strided_slice %205 {offsets = [0, 0], sizes = [8, 32], strides = [1, 1]} : vector<8x64xf32> to vector<8x32xf32>
      %207 = arith.truncf %206 : vector<8x32xf32> to vector<8x32xbf16>
      %c0_125 = arith.constant 0 : index
      %c0_126 = arith.constant 0 : index
      %208 = vector.load %arg19[%c0_125, %c0_126] : memref<8x32xbf16, #tpu.memory_space<vmem>>, vector<8x32xbf16>
      tpu.vector_store %arg19[%c0_125, %c0_126], %207 {strides = array<i32>} : memref<8x32xbf16, #tpu.memory_space<vmem>>, vector<8x32xbf16>,
      %209 = vector.extract_strided_slice %205 {offsets = [0, 32], sizes = [8, 32], strides = [1, 1]} : vector<8x64xf32> to vector<8x32xf32>
      %210 = arith.truncf %209 : vector<8x32xf32> to vector<8x32xbf16>
      %c0_127 = arith.constant 0 : index
      %c0_128 = arith.constant 0 : index
      %211 = vector.load %arg20[%c0_127, %c0_128] : memref<8x32xbf16, #tpu.memory_space<vmem>>, vector<8x32xbf16>
      tpu.vector_store %arg20[%c0_127, %c0_128], %210 {strides = array<i32>} : memref<8x32xbf16, #tpu.memory_space<vmem>>, vector<8x32xbf16>,
    } else {
    }
    %c8_i32 = arith.constant 8 : i32
    %3 = arith.muli %arg1, %c8_i32 : i32
    %4 = tpu.assume_multiple %3, 8 : i32
    %c0 = arith.constant 0 : index
    %5 = arith.index_cast %4 : i32 to index
    %c0_1 = arith.constant 0 : index
    %6 = vector.load %arg2[%c0, %5, %c0_1] : memref<1x8x32xbf16, #tpu.memory_space<vmem>>, vector<1x8x32xbf16>
    %7 = vector.shape_cast %6 : vector<1x8x32xbf16> to vector<8x32xbf16>
    %8 = arith.extf %7 : vector<8x32xbf16> to vector<8x32xf32>
    %c0_2 = arith.constant 0 : index
    %c0_3 = arith.constant 0 : index
    %c0_4 = arith.constant 0 : index
    %9 = vector.load %arg3[%c0_2, %c0_3, %c0_4] : memref<1x1x8xf32, #tpu.memory_space<vmem>>, vector<1x1x8xf32>
    %10 = vector.shape_cast %9 : vector<1x1x8xf32> to vector<1x8xf32>
    %cst = arith.constant 1.000000e+00 : f32
    %11 = vector.broadcast %cst : f32 to vector<1x8xf32>
    %12 = arith.subf %10, %11 : vector<1x8xf32>
    %cst_5 = arith.constant 1.000000e+09 : f32
    %13 = vector.broadcast %cst_5 : f32 to vector<1x8xf32>
    %14 = arith.mulf %12, %13 : vector<1x8xf32>
    %c0_6 = arith.constant 0 : index
    %c0_7 = arith.constant 0 : index
    %15 = vector.load %arg4[%c0_6, %c0_7] : memref<32x32xbf16, #tpu.memory_space<vmem>>, vector<32x32xbf16>
    %cst_8 = arith.constant dense<0.000000e+00> : vector<8x32xf32>
    %16 = tpu.matmul %7, %15, %cst_8 {dimension_numbers = #tpu.dot_dimension_numbers<[1], [0], [0], [1], [0, 0, 1, 1], [], []>} : vector<8x32xbf16>, vector<32x32xbf16>, vector<8x32xf32> -> vector<8x32xf32>
    %c0_9 = arith.constant 0 : index
    %c0_10 = arith.constant 0 : index
    %17 = vector.load %arg5[%c0_9, %c0_10] : memref<1x32xf32, #tpu.memory_space<vmem>>, vector<1x32xf32>
    %18 = vector.broadcast %17 : vector<1x32xf32> to vector<8x32xf32>
    %19 = arith.addf %16, %18 : vector<8x32xf32>
    %cst_11 = arith.constant 0.353553385 : f32
    %20 = vector.broadcast %cst_11 : f32 to vector<8x32xf32>
    %21 = arith.mulf %19, %20 : vector<8x32xf32>
    %22 = arith.truncf %21 : vector<8x32xf32> to vector<8x32xbf16>
    %cst_12 = arith.constant 0.000000e+00 : f32
    %23 = vector.broadcast %cst_12 : f32 to vector<8x32xf32>
    %c0_13 = arith.constant 0 : index
    %c0_14 = arith.constant 0 : index
    %24 = vector.load %arg21[%c0_13, %c0_14] : memref<8x32xf32, #tpu.memory_space<vmem>>, vector<8x32xf32>
    tpu.vector_store %arg21[%c0_13, %c0_14], %23 {strides = array<i32>} : memref<8x32xf32, #tpu.memory_space<vmem>>, vector<8x32xf32>,
    %25 = vector.extract_strided_slice %22 {offsets = [0, 0], sizes = [8, 8], strides = [1, 1]} : vector<8x32xbf16> to vector<8x8xbf16>
    %c0_15 = arith.constant 0 : index
    %c0_16 = arith.constant 0 : index
    %26 = vector.load %arg19[%c0_15, %c0_16] : memref<8x32xbf16, #tpu.memory_space<vmem>>, vector<8x8xbf16>
    %c0_17 = arith.constant 0 : index
    %c0_18 = arith.constant 0 : index
    %27 = vector.load %arg20[%c0_17, %c0_18] : memref<8x32xbf16, #tpu.memory_space<vmem>>, vector<8x8xbf16>
    %cst_19 = arith.constant dense<0.000000e+00> : vector<8x8xf32>
    %28 = tpu.matmul %25, %26, %cst_19 {dimension_numbers = #tpu.dot_dimension_numbers<[1], [1], [0], [0], [0, 0, 1, 0], [], []>} : vector<8x8xbf16>, vector<8x8xbf16>, vector<8x8xf32> -> vector<8x8xf32>
    %29 = vector.broadcast %14 : vector<1x8xf32> to vector<8x8xf32>
    %30 = arith.addf %28, %29 : vector<8x8xf32>
    %cst_20 = arith.constant dense<0xFF800000> : vector<8xf32>
    %31 = vector.multi_reduction <maximumf>, %30, %cst_20 [1] : vector<8x8xf32> to vector<8xf32>
    %32 = vector.shape_cast %31 : vector<8xf32> to vector<8x1xf32>
    %33 = vector.broadcast %32 : vector<8x1xf32> to vector<8x8xf32>
    %34 = arith.subf %30, %33 : vector<8x8xf32>
    %35 = math.exp %34 : vector<8x8xf32>
    %cst_21 = arith.constant dense<0.000000e+00> : vector<8xf32>
    %36 = vector.multi_reduction <add>, %35, %cst_21 [1] : vector<8x8xf32> to vector<8xf32>
    %37 = vector.shape_cast %36 : vector<8xf32> to vector<8x1xf32>
    %38 = arith.truncf %35 : vector<8x8xf32> to vector<8x8xbf16>
    %cst_22 = arith.constant dense<0.000000e+00> : vector<8x8xf32>
    %39 = tpu.matmul %38, %27, %cst_22 {dimension_numbers = #tpu.dot_dimension_numbers<[1], [0], [0], [1], [0, 0, 1, 1], [], []>} : vector<8x8xbf16>, vector<8x8xbf16>, vector<8x8xf32> -> vector<8x8xf32>
    %40 = tpu.reciprocal %37 {approx = true} : vector<8x1xf32> -> vector<8x1xf32>
    %41 = vector.broadcast %40 : vector<8x1xf32> to vector<8x8xf32>
    %42 = arith.mulf %39, %41 : vector<8x8xf32>
    %c0_23 = arith.constant 0 : index
    %c0_24 = arith.constant 0 : index
    %43 = vector.load %arg21[%c0_23, %c0_24] : memref<8x32xf32, #tpu.memory_space<vmem>>, vector<8x32xf32>
    %44 = arith.truncf %42 : vector<8x8xf32> to vector<8x8xbf16>
    %c0_25 = arith.constant 0 : index
    %c0_26 = arith.constant 0 : index
    %45 = vector.load %arg8[%c0_25, %c0_26] : memref<32x32xbf16, #tpu.memory_space<vmem>>, vector<8x32xbf16>
    %cst_27 = arith.constant dense<0.000000e+00> : vector<8x32xf32>
    %46 = tpu.matmul %44, %45, %cst_27 {dimension_numbers = #tpu.dot_dimension_numbers<[1], [0], [0], [1], [0, 0, 1, 1], [], []>} : vector<8x8xbf16>, vector<8x32xbf16>, vector<8x32xf32> -> vector<8x32xf32>
    %47 = arith.addf %43, %46 : vector<8x32xf32>
    %c0_28 = arith.constant 0 : index
    %c0_29 = arith.constant 0 : index
    %48 = vector.load %arg21[%c0_28, %c0_29] : memref<8x32xf32, #tpu.memory_space<vmem>>, vector<8x32xf32>
    tpu.vector_store %arg21[%c0_28, %c0_29], %47 {strides = array<i32>} : memref<8x32xf32, #tpu.memory_space<vmem>>, vector<8x32xf32>,
    %49 = vector.extract_strided_slice %22 {offsets = [0, 8], sizes = [8, 8], strides = [1, 1]} : vector<8x32xbf16> to vector<8x8xbf16>
    %c0_30 = arith.constant 0 : index
    %c8 = arith.constant 8 : index
    %50 = vector.load %arg19[%c0_30, %c8] : memref<8x32xbf16, #tpu.memory_space<vmem>>, vector<8x8xbf16>
    %c0_31 = arith.constant 0 : index
    %c8_32 = arith.constant 8 : index
    %51 = vector.load %arg20[%c0_31, %c8_32] : memref<8x32xbf16, #tpu.memory_space<vmem>>, vector<8x8xbf16>
    %cst_33 = arith.constant dense<0.000000e+00> : vector<8x8xf32>
    %52 = tpu.matmul %49, %50, %cst_33 {dimension_numbers = #tpu.dot_dimension_numbers<[1], [1], [0], [0], [0, 0, 1, 0], [], []>} : vector<8x8xbf16>, vector<8x8xbf16>, vector<8x8xf32> -> vector<8x8xf32>
    %53 = vector.broadcast %14 : vector<1x8xf32> to vector<8x8xf32>
    %54 = arith.addf %52, %53 : vector<8x8xf32>
    %cst_34 = arith.constant dense<0xFF800000> : vector<8xf32>
    %55 = vector.multi_reduction <maximumf>, %54, %cst_34 [1] : vector<8x8xf32> to vector<8xf32>
    %56 = vector.shape_cast %55 : vector<8xf32> to vector<8x1xf32>
    %57 = vector.broadcast %56 : vector<8x1xf32> to vector<8x8xf32>
    %58 = arith.subf %54, %57 : vector<8x8xf32>
    %59 = math.exp %58 : vector<8x8xf32>
    %cst_35 = arith.constant dense<0.000000e+00> : vector<8xf32>
    %60 = vector.multi_reduction <add>, %59, %cst_35 [1] : vector<8x8xf32> to vector<8xf32>
    %61 = vector.shape_cast %60 : vector<8xf32> to vector<8x1xf32>
    %62 = arith.truncf %59 : vector<8x8xf32> to vector<8x8xbf16>
    %cst_36 = arith.constant dense<0.000000e+00> : vector<8x8xf32>
    %63 = tpu.matmul %62, %51, %cst_36 {dimension_numbers = #tpu.dot_dimension_numbers<[1], [0], [0], [1], [0, 0, 1, 1], [], []>} : vector<8x8xbf16>, vector<8x8xbf16>, vector<8x8xf32> -> vector<8x8xf32>
    %64 = tpu.reciprocal %61 {approx = true} : vector<8x1xf32> -> vector<8x1xf32>
    %65 = vector.broadcast %64 : vector<8x1xf32> to vector<8x8xf32>
    %66 = arith.mulf %63, %65 : vector<8x8xf32>
    %c0_37 = arith.constant 0 : index
    %c0_38 = arith.constant 0 : index
    %67 = vector.load %arg21[%c0_37, %c0_38] : memref<8x32xf32, #tpu.memory_space<vmem>>, vector<8x32xf32>
    %68 = arith.truncf %66 : vector<8x8xf32> to vector<8x8xbf16>
    %c8_39 = arith.constant 8 : index
    %c0_40 = arith.constant 0 : index
    %69 = vector.load %arg8[%c8_39, %c0_40] : memref<32x32xbf16, #tpu.memory_space<vmem>>, vector<8x32xbf16>
    %cst_41 = arith.constant dense<0.000000e+00> : vector<8x32xf32>
    %70 = tpu.matmul %68, %69, %cst_41 {dimension_numbers = #tpu.dot_dimension_numbers<[1], [0], [0], [1], [0, 0, 1, 1], [], []>} : vector<8x8xbf16>, vector<8x32xbf16>, vector<8x32xf32> -> vector<8x32xf32>
    %71 = arith.addf %67, %70 : vector<8x32xf32>
    %c0_42 = arith.constant 0 : index
    %c0_43 = arith.constant 0 : index
    %72 = vector.load %arg21[%c0_42, %c0_43] : memref<8x32xf32, #tpu.memory_space<vmem>>, vector<8x32xf32>
    tpu.vector_store %arg21[%c0_42, %c0_43], %71 {strides = array<i32>} : memref<8x32xf32, #tpu.memory_space<vmem>>, vector<8x32xf32>,
    %73 = vector.extract_strided_slice %22 {offsets = [0, 16], sizes = [8, 8], strides = [1, 1]} : vector<8x32xbf16> to vector<8x8xbf16>
    %c0_44 = arith.constant 0 : index
    %c16 = arith.constant 16 : index
    %74 = vector.load %arg19[%c0_44, %c16] : memref<8x32xbf16, #tpu.memory_space<vmem>>, vector<8x8xbf16>
    %c0_45 = arith.constant 0 : index
    %c16_46 = arith.constant 16 : index
    %75 = vector.load %arg20[%c0_45, %c16_46] : memref<8x32xbf16, #tpu.memory_space<vmem>>, vector<8x8xbf16>
    %cst_47 = arith.constant dense<0.000000e+00> : vector<8x8xf32>
    %76 = tpu.matmul %73, %74, %cst_47 {dimension_numbers = #tpu.dot_dimension_numbers<[1], [1], [0], [0], [0, 0, 1, 0], [], []>} : vector<8x8xbf16>, vector<8x8xbf16>, vector<8x8xf32> -> vector<8x8xf32>
    %77 = vector.broadcast %14 : vector<1x8xf32> to vector<8x8xf32>
    %78 = arith.addf %76, %77 : vector<8x8xf32>
    %cst_48 = arith.constant dense<0xFF800000> : vector<8xf32>
    %79 = vector.multi_reduction <maximumf>, %78, %cst_48 [1] : vector<8x8xf32> to vector<8xf32>
    %80 = vector.shape_cast %79 : vector<8xf32> to vector<8x1xf32>
    %81 = vector.broadcast %80 : vector<8x1xf32> to vector<8x8xf32>
    %82 = arith.subf %78, %81 : vector<8x8xf32>
    %83 = math.exp %82 : vector<8x8xf32>
    %cst_49 = arith.constant dense<0.000000e+00> : vector<8xf32>
    %84 = vector.multi_reduction <add>, %83, %cst_49 [1] : vector<8x8xf32> to vector<8xf32>
    %85 = vector.shape_cast %84 : vector<8xf32> to vector<8x1xf32>
    %86 = arith.truncf %83 : vector<8x8xf32> to vector<8x8xbf16>
    %cst_50 = arith.constant dense<0.000000e+00> : vector<8x8xf32>
    %87 = tpu.matmul %86, %75, %cst_50 {dimension_numbers = #tpu.dot_dimension_numbers<[1], [0], [0], [1], [0, 0, 1, 1], [], []>} : vector<8x8xbf16>, vector<8x8xbf16>, vector<8x8xf32> -> vector<8x8xf32>
    %88 = tpu.reciprocal %85 {approx = true} : vector<8x1xf32> -> vector<8x1xf32>
    %89 = vector.broadcast %88 : vector<8x1xf32> to vector<8x8xf32>
    %90 = arith.mulf %87, %89 : vector<8x8xf32>
    %c0_51 = arith.constant 0 : index
    %c0_52 = arith.constant 0 : index
    %91 = vector.load %arg21[%c0_51, %c0_52] : memref<8x32xf32, #tpu.memory_space<vmem>>, vector<8x32xf32>
    %92 = arith.truncf %90 : vector<8x8xf32> to vector<8x8xbf16>
    %c16_53 = arith.constant 16 : index
    %c0_54 = arith.constant 0 : index
    %93 = vector.load %arg8[%c16_53, %c0_54] : memref<32x32xbf16, #tpu.memory_space<vmem>>, vector<8x32xbf16>
    %cst_55 = arith.constant dense<0.000000e+00> : vector<8x32xf32>
    %94 = tpu.matmul %92, %93, %cst_55 {dimension_numbers = #tpu.dot_dimension_numbers<[1], [0], [0], [1], [0, 0, 1, 1], [], []>} : vector<8x8xbf16>, vector<8x32xbf16>, vector<8x32xf32> -> vector<8x32xf32>
    %95 = arith.addf %91, %94 : vector<8x32xf32>
    %c0_56 = arith.constant 0 : index
    %c0_57 = arith.constant 0 : index
    %96 = vector.load %arg21[%c0_56, %c0_57] : memref<8x32xf32, #tpu.memory_space<vmem>>, vector<8x32xf32>
    tpu.vector_store %arg21[%c0_56, %c0_57], %95 {strides = array<i32>} : memref<8x32xf32, #tpu.memory_space<vmem>>, vector<8x32xf32>,
    %97 = vector.extract_strided_slice %22 {offsets = [0, 24], sizes = [8, 8], strides = [1, 1]} : vector<8x32xbf16> to vector<8x8xbf16>
    %c0_58 = arith.constant 0 : index
    %c24 = arith.constant 24 : index
    %98 = vector.load %arg19[%c0_58, %c24] : memref<8x32xbf16, #tpu.memory_space<vmem>>, vector<8x8xbf16>
    %c0_59 = arith.constant 0 : index
    %c24_60 = arith.constant 24 : index
    %99 = vector.load %arg20[%c0_59, %c24_60] : memref<8x32xbf16, #tpu.memory_space<vmem>>, vector<8x8xbf16>
    %cst_61 = arith.constant dense<0.000000e+00> : vector<8x8xf32>
    %100 = tpu.matmul %97, %98, %cst_61 {dimension_numbers = #tpu.dot_dimension_numbers<[1], [1], [0], [0], [0, 0, 1, 0], [], []>} : vector<8x8xbf16>, vector<8x8xbf16>, vector<8x8xf32> -> vector<8x8xf32>
    %101 = vector.broadcast %14 : vector<1x8xf32> to vector<8x8xf32>
    %102 = arith.addf %100, %101 : vector<8x8xf32>
    %cst_62 = arith.constant dense<0xFF800000> : vector<8xf32>
    %103 = vector.multi_reduction <maximumf>, %102, %cst_62 [1] : vector<8x8xf32> to vector<8xf32>
    %104 = vector.shape_cast %103 : vector<8xf32> to vector<8x1xf32>
    %105 = vector.broadcast %104 : vector<8x1xf32> to vector<8x8xf32>
    %106 = arith.subf %102, %105 : vector<8x8xf32>
    %107 = math.exp %106 : vector<8x8xf32>
    %cst_63 = arith.constant dense<0.000000e+00> : vector<8xf32>
    %108 = vector.multi_reduction <add>, %107, %cst_63 [1] : vector<8x8xf32> to vector<8xf32>
    %109 = vector.shape_cast %108 : vector<8xf32> to vector<8x1xf32>
    %110 = arith.truncf %107 : vector<8x8xf32> to vector<8x8xbf16>
    %cst_64 = arith.constant dense<0.000000e+00> : vector<8x8xf32>
    %111 = tpu.matmul %110, %99, %cst_64 {dimension_numbers = #tpu.dot_dimension_numbers<[1], [0], [0], [1], [0, 0, 1, 1], [], []>} : vector<8x8xbf16>, vector<8x8xbf16>, vector<8x8xf32> -> vector<8x8xf32>
    %112 = tpu.reciprocal %109 {approx = true} : vector<8x1xf32> -> vector<8x1xf32>
    %113 = vector.broadcast %112 : vector<8x1xf32> to vector<8x8xf32>
    %114 = arith.mulf %111, %113 : vector<8x8xf32>
    %c0_65 = arith.constant 0 : index
    %c0_66 = arith.constant 0 : index
    %115 = vector.load %arg21[%c0_65, %c0_66] : memref<8x32xf32, #tpu.memory_space<vmem>>, vector<8x32xf32>
    %116 = arith.truncf %114 : vector<8x8xf32> to vector<8x8xbf16>
    %c24_67 = arith.constant 24 : index
    %c0_68 = arith.constant 0 : index
    %117 = vector.load %arg8[%c24_67, %c0_68] : memref<32x32xbf16, #tpu.memory_space<vmem>>, vector<8x32xbf16>
    %cst_69 = arith.constant dense<0.000000e+00> : vector<8x32xf32>
    %118 = tpu.matmul %116, %117, %cst_69 {dimension_numbers = #tpu.dot_dimension_numbers<[1], [0], [0], [1], [0, 0, 1, 1], [], []>} : vector<8x8xbf16>, vector<8x32xbf16>, vector<8x32xf32> -> vector<8x32xf32>
    %119 = arith.addf %115, %118 : vector<8x32xf32>
    %c0_70 = arith.constant 0 : index
    %c0_71 = arith.constant 0 : index
    %120 = vector.load %arg21[%c0_70, %c0_71] : memref<8x32xf32, #tpu.memory_space<vmem>>, vector<8x32xf32>
    tpu.vector_store %arg21[%c0_70, %c0_71], %119 {strides = array<i32>} : memref<8x32xf32, #tpu.memory_space<vmem>>, vector<8x32xf32>,
    %c0_72 = arith.constant 0 : index
    %c0_73 = arith.constant 0 : index
    %121 = vector.load %arg21[%c0_72, %c0_73] : memref<8x32xf32, #tpu.memory_space<vmem>>, vector<8x32xf32>
    %c0_74 = arith.constant 0 : index
    %c0_75 = arith.constant 0 : index
    %122 = vector.load %arg9[%c0_74, %c0_75] : memref<1x32xf32, #tpu.memory_space<vmem>>, vector<1x32xf32>
    %123 = vector.broadcast %122 : vector<1x32xf32> to vector<8x32xf32>
    %124 = arith.addf %121, %123 : vector<8x32xf32>
    %125 = arith.addf %8, %124 : vector<8x32xf32>
    %cst_76 = arith.constant dense<0.000000e+00> : vector<8xf32>
    %126 = vector.multi_reduction <add>, %125, %cst_76 [1] : vector<8x32xf32> to vector<8xf32>
    %127 = vector.shape_cast %126 : vector<8xf32> to vector<8x1xf32>
    %cst_77 = arith.constant 3.200000e+01 : f32
    %128 = vector.broadcast %cst_77 : f32 to vector<8x1xf32>
    %129 = arith.divf %127, %128 : vector<8x1xf32>
    %130 = vector.broadcast %129 : vector<8x1xf32> to vector<8x32xf32>
    %131 = arith.subf %125, %130 : vector<8x32xf32>
    %132 = arith.mulf %131, %131 : vector<8x32xf32>
    %cst_78 = arith.constant dense<0.000000e+00> : vector<8xf32>
    %133 = vector.multi_reduction <add>, %132, %cst_78 [1] : vector<8x32xf32> to vector<8xf32>
    %134 = vector.shape_cast %133 : vector<8xf32> to vector<8x1xf32>
    %cst_79 = arith.constant 3.200000e+01 : f32
    %135 = vector.broadcast %cst_79 : f32 to vector<8x1xf32>
    %136 = arith.divf %134, %135 : vector<8x1xf32>
    %137 = vector.broadcast %129 : vector<8x1xf32> to vector<8x32xf32>
    %138 = arith.subf %125, %137 : vector<8x32xf32>
    %cst_80 = arith.constant 9.99999974E-6 : f32
    %139 = vector.broadcast %cst_80 : f32 to vector<8x1xf32>
    %140 = arith.addf %136, %139 : vector<8x1xf32>
    %141 = math.rsqrt %140 : vector<8x1xf32>
    %142 = vector.broadcast %141 : vector<8x1xf32> to vector<8x32xf32>
    %143 = arith.mulf %138, %142 : vector<8x32xf32>
    %c0_81 = arith.constant 0 : index
    %c0_82 = arith.constant 0 : index
    %144 = vector.load %arg10[%c0_81, %c0_82] : memref<1x32xf32, #tpu.memory_space<vmem>>, vector<1x32xf32>
    %145 = vector.broadcast %144 : vector<1x32xf32> to vector<8x32xf32>
    %146 = arith.mulf %143, %145 : vector<8x32xf32>
    %c0_83 = arith.constant 0 : index
    %c0_84 = arith.constant 0 : index
    %147 = vector.load %arg11[%c0_83, %c0_84] : memref<1x32xf32, #tpu.memory_space<vmem>>, vector<1x32xf32>
    %148 = vector.broadcast %147 : vector<1x32xf32> to vector<8x32xf32>
    %149 = arith.addf %146, %148 : vector<8x32xf32>
    %150 = arith.truncf %149 : vector<8x32xf32> to vector<8x32xbf16>
    %cst_85 = arith.constant 0.000000e+00 : f32
    %151 = vector.broadcast %cst_85 : f32 to vector<8x32xf32>
    %c0_86 = arith.constant 0 : index
    %c0_87 = arith.constant 0 : index
    %152 = vector.load %arg21[%c0_86, %c0_87] : memref<8x32xf32, #tpu.memory_space<vmem>>, vector<8x32xf32>
    tpu.vector_store %arg21[%c0_86, %c0_87], %151 {strides = array<i32>} : memref<8x32xf32, #tpu.memory_space<vmem>>, vector<8x32xf32>,
    %c0_88 = arith.constant 0 : index
    %c0_89 = arith.constant 0 : index
    %153 = vector.load %arg12[%c0_88, %c0_89] : memref<32x128xbf16, #tpu.memory_space<vmem>>, vector<32x128xbf16>
    %cst_90 = arith.constant dense<0.000000e+00> : vector<8x128xf32>
    %154 = tpu.matmul %150, %153, %cst_90 {dimension_numbers = #tpu.dot_dimension_numbers<[1], [0], [0], [1], [0, 0, 1, 1], [], []>} : vector<8x32xbf16>, vector<32x128xbf16>, vector<8x128xf32> -> vector<8x128xf32>
    %c0_91 = arith.constant 0 : index
    %c0_92 = arith.constant 0 : index
    %155 = vector.load %arg13[%c0_91, %c0_92] : memref<1x128xf32, #tpu.memory_space<vmem>>, vector<1x128xf32>
    %156 = vector.broadcast %155 : vector<1x128xf32> to vector<8x128xf32>
    %157 = arith.addf %154, %156 : vector<8x128xf32>
    %cst_93 = arith.constant 0.000000e+00 : f32
    %158 = vector.broadcast %cst_93 : f32 to vector<8x128xf32>
    %159 = arith.maximumf %157, %158 : vector<8x128xf32>
    %160 = arith.truncf %159 : vector<8x128xf32> to vector<8x128xbf16>
    %c0_94 = arith.constant 0 : index
    %c0_95 = arith.constant 0 : index
    %161 = vector.load %arg21[%c0_94, %c0_95] : memref<8x32xf32, #tpu.memory_space<vmem>>, vector<8x32xf32>
    %c0_96 = arith.constant 0 : index
    %c0_97 = arith.constant 0 : index
    %162 = vector.load %arg14[%c0_96, %c0_97] : memref<128x32xbf16, #tpu.memory_space<vmem>>, vector<128x32xbf16>
    %cst_98 = arith.constant dense<0.000000e+00> : vector<8x32xf32>
    %163 = tpu.matmul %160, %162, %cst_98 {dimension_numbers = #tpu.dot_dimension_numbers<[1], [0], [0], [1], [0, 0, 1, 1], [], []>} : vector<8x128xbf16>, vector<128x32xbf16>, vector<8x32xf32> -> vector<8x32xf32>
    %164 = arith.addf %161, %163 : vector<8x32xf32>
    %c0_99 = arith.constant 0 : index
    %c0_100 = arith.constant 0 : index
    %165 = vector.load %arg21[%c0_99, %c0_100] : memref<8x32xf32, #tpu.memory_space<vmem>>, vector<8x32xf32>
    tpu.vector_store %arg21[%c0_99, %c0_100], %164 {strides = array<i32>} : memref<8x32xf32, #tpu.memory_space<vmem>>, vector<8x32xf32>,
    %c0_101 = arith.constant 0 : index
    %c0_102 = arith.constant 0 : index
    %166 = vector.load %arg21[%c0_101, %c0_102] : memref<8x32xf32, #tpu.memory_space<vmem>>, vector<8x32xf32>
    %c0_103 = arith.constant 0 : index
    %c0_104 = arith.constant 0 : index
    %167 = vector.load %arg15[%c0_103, %c0_104] : memref<1x32xf32, #tpu.memory_space<vmem>>, vector<1x32xf32>
    %168 = vector.broadcast %167 : vector<1x32xf32> to vector<8x32xf32>
    %169 = arith.addf %166, %168 : vector<8x32xf32>
    %170 = arith.addf %149, %169 : vector<8x32xf32>
    %cst_105 = arith.constant dense<0.000000e+00> : vector<8xf32>
    %171 = vector.multi_reduction <add>, %170, %cst_105 [1] : vector<8x32xf32> to vector<8xf32>
    %172 = vector.shape_cast %171 : vector<8xf32> to vector<8x1xf32>
    %cst_106 = arith.constant 3.200000e+01 : f32
    %173 = vector.broadcast %cst_106 : f32 to vector<8x1xf32>
    %174 = arith.divf %172, %173 : vector<8x1xf32>
    %175 = vector.broadcast %174 : vector<8x1xf32> to vector<8x32xf32>
    %176 = arith.subf %170, %175 : vector<8x32xf32>
    %177 = arith.mulf %176, %176 : vector<8x32xf32>
    %cst_107 = arith.constant dense<0.000000e+00> : vector<8xf32>
    %178 = vector.multi_reduction <add>, %177, %cst_107 [1] : vector<8x32xf32> to vector<8xf32>
    %179 = vector.shape_cast %178 : vector<8xf32> to vector<8x1xf32>
    %cst_108 = arith.constant 3.200000e+01 : f32
    %180 = vector.broadcast %cst_108 : f32 to vector<8x1xf32>
    %181 = arith.divf %179, %180 : vector<8x1xf32>
    %182 = vector.broadcast %174 : vector<8x1xf32> to vector<8x32xf32>
    %183 = arith.subf %170, %182 : vector<8x32xf32>
    %cst_109 = arith.constant 9.99999974E-6 : f32
    %184 = vector.broadcast %cst_109 : f32 to vector<8x1xf32>
    %185 = arith.addf %181, %184 : vector<8x1xf32>
    %186 = math.rsqrt %185 : vector<8x1xf32>
    %187 = vector.broadcast %186 : vector<8x1xf32> to vector<8x32xf32>
    %188 = arith.mulf %183, %187 : vector<8x32xf32>
    %c0_110 = arith.constant 0 : index
    %c0_111 = arith.constant 0 : index
    %189 = vector.load %arg16[%c0_110, %c0_111] : memref<1x32xf32, #tpu.memory_space<vmem>>, vector<1x32xf32>
    %190 = vector.broadcast %189 : vector<1x32xf32> to vector<8x32xf32>
    %191 = arith.mulf %188, %190 : vector<8x32xf32>
    %c0_112 = arith.constant 0 : index
    %c0_113 = arith.constant 0 : index
    %192 = vector.load %arg17[%c0_112, %c0_113] : memref<1x32xf32, #tpu.memory_space<vmem>>, vector<1x32xf32>
    %193 = vector.broadcast %192 : vector<1x32xf32> to vector<8x32xf32>
    %194 = arith.addf %191, %193 : vector<8x32xf32>
    %195 = arith.truncf %194 : vector<8x32xf32> to vector<8x32xbf16>
    %c0_114 = arith.constant 0 : index
    %c0_115 = arith.constant 0 : index
    %c0_116 = arith.constant 0 : index
    %196 = vector.load %arg18[%c0_114, %c0_115, %c0_116] : memref<1x8x32xbf16, #tpu.memory_space<vmem>>, vector<1x8x32xbf16>
    %197 = vector.shape_cast %196 : vector<1x8x32xbf16> to vector<8x32xbf16>
    %198 = vector.shape_cast %195 : vector<8x32xbf16> to vector<1x8x32xbf16>
    tpu.vector_store %arg18[%c0_114, %c0_115, %c0_116], %198 {strides = array<i32>} : memref<1x8x32xbf16, #tpu.memory_space<vmem>>, vector<1x8x32xbf16>,
    return
  }
  func.func @transform_0(%arg0: i32, %arg1: i32) -> (i32, i32, i32) {
    %c0_i32 = arith.constant 0 : i32
    %c0_i32_0 = arith.constant 0 : i32
    %c0_i32_1 = arith.constant 0 : i32
    return %arg0, %c0_i32, %c0_i32_0 : i32, i32, i32
  }
  func.func @transform_1(%arg0: i32, %arg1: i32) -> (i32, i32, i32) {
    %c0_i32 = arith.constant 0 : i32
    %c0_i32_0 = arith.constant 0 : i32
    %c0_i32_1 = arith.constant 0 : i32
    return %arg0, %c0_i32, %c0_i32_0 : i32, i32, i32
  }
  func.func @transform_2(%arg0: i32, %arg1: i32) -> (i32, i32) {
    %c0_i32 = arith.constant 0 : i32
    %c0_i32_0 = arith.constant 0 : i32
    %c0_i32_1 = arith.constant 0 : i32
    return %c0_i32, %c0_i32_0 : i32, i32
  }
  func.func @transform_3(%arg0: i32, %arg1: i32) -> (i32, i32) {
    %c0_i32 = arith.constant 0 : i32
    %c0_i32_0 = arith.constant 0 : i32
    %c0_i32_1 = arith.constant 0 : i32
    return %c0_i32, %c0_i32_0 : i32, i32
  }
  func.func @transform_4(%arg0: i32, %arg1: i32) -> (i32, i32) {
    %c0_i32 = arith.constant 0 : i32
    %c0_i32_0 = arith.constant 0 : i32
    %c0_i32_1 = arith.constant 0 : i32
    return %c0_i32, %c0_i32_0 : i32, i32
  }
  func.func @transform_5(%arg0: i32, %arg1: i32) -> (i32, i32) {
    %c0_i32 = arith.constant 0 : i32
    %c0_i32_0 = arith.constant 0 : i32
    %c0_i32_1 = arith.constant 0 : i32
    return %c0_i32, %c0_i32_0 : i32, i32
  }
  func.func @transform_6(%arg0: i32, %arg1: i32) -> (i32, i32) {
    %c0_i32 = arith.constant 0 : i32
    %c0_i32_0 = arith.constant 0 : i32
    %c0_i32_1 = arith.constant 0 : i32
    return %c0_i32, %c0_i32_0 : i32, i32
  }
  func.func @transform_7(%arg0: i32, %arg1: i32) -> (i32, i32) {
    %c0_i32 = arith.constant 0 : i32
    %c0_i32_0 = arith.constant 0 : i32
    %c0_i32_1 = arith.constant 0 : i32
    return %c0_i32, %c0_i32_0 : i32, i32
  }
  func.func @transform_8(%arg0: i32, %arg1: i32) -> (i32, i32) {
    %c0_i32 = arith.constant 0 : i32
    %c0_i32_0 = arith.constant 0 : i32
    %c0_i32_1 = arith.constant 0 : i32
    return %c0_i32, %c0_i32_0 : i32, i32
  }
  func.func @transform_9(%arg0: i32, %arg1: i32) -> (i32, i32) {
    %c0_i32 = arith.constant 0 : i32
    %c0_i32_0 = arith.constant 0 : i32
    %c0_i32_1 = arith.constant 0 : i32
    return %c0_i32, %c0_i32_0 : i32, i32
  }
  func.func @transform_10(%arg0: i32, %arg1: i32) -> (i32, i32) {
    %c0_i32 = arith.constant 0 : i32
    %c0_i32_0 = arith.constant 0 : i32
    %c0_i32_1 = arith.constant 0 : i32
    return %c0_i32, %c0_i32_0 : i32, i32
  }
  func.func @transform_11(%arg0: i32, %arg1: i32) -> (i32, i32) {
    %c0_i32 = arith.constant 0 : i32
    %c0_i32_0 = arith.constant 0 : i32
    %c0_i32_1 = arith.constant 0 : i32
    return %c0_i32, %c0_i32_0 : i32, i32
  }
  func.func @transform_12(%arg0: i32, %arg1: i32) -> (i32, i32) {
    %c0_i32 = arith.constant 0 : i32
    %c0_i32_0 = arith.constant 0 : i32
    %c0_i32_1 = arith.constant 0 : i32
    return %c0_i32, %c0_i32_0 : i32, i32
  }
  func.func @transform_13(%arg0: i32, %arg1: i32) -> (i32, i32) {
    %c0_i32 = arith.constant 0 : i32
    %c0_i32_0 = arith.constant 0 : i32
    %c0_i32_1 = arith.constant 0 : i32
    return %c0_i32, %c0_i32_0 : i32, i32
  }
  func.func @transform_14(%arg0: i32, %arg1: i32) -> (i32, i32) {
    %c0_i32 = arith.constant 0 : i32
    %c0_i32_0 = arith.constant 0 : i32
    %c0_i32_1 = arith.constant 0 : i32
    return %c0_i32, %c0_i32_0 : i32, i32
  }
  func.func @transform_15(%arg0: i32, %arg1: i32) -> (i32, i32) {
    %c0_i32 = arith.constant 0 : i32
    %c0_i32_0 = arith.constant 0 : i32
    %c0_i32_1 = arith.constant 0 : i32
    return %c0_i32, %c0_i32_0 : i32, i32
  }
  func.func @transform_16(%arg0: i32, %arg1: i32) -> (i32, i32, i32) {
    %c0_i32 = arith.constant 0 : i32
    %c0_i32_0 = arith.constant 0 : i32
    return %arg0, %arg1, %c0_i32 : i32, i32, i32
  }
}

module attributes {stable_mosaic.version = 11 : i64} {
  func.func @_encoder_layer_kernel(%arg0: i32, %arg1: i32, %arg2: memref<1x8x32xbf16, #tpu.memory_space<vmem>>, %arg3: memref<1x1x8xf32, #tpu.memory_space<vmem>>, %arg4: memref<32x32xbf16, #tpu.memory_space<vmem>>, %arg5: memref<1x32xf32, #tpu.memory_space<vmem>>, %arg6: memref<32x64xbf16, #tpu.memory_space<vmem>>, %arg7: memref<1x64xf32, #tpu.memory_space<vmem>>, %arg8: memref<32x32xbf16, #tpu.memory_space<vmem>>, %arg9: memref<1x32xf32, #tpu.memory_space<vmem>>, %arg10: memref<1x32xf32, #tpu.memory_space<vmem>>, %arg11: memref<1x32xf32, #tpu.memory_space<vmem>>, %arg12: memref<32x128xbf16, #tpu.memory_space<vmem>>, %arg13: memref<1x128xf32, #tpu.memory_space<vmem>>, %arg14: memref<128x32xbf16, #tpu.memory_space<vmem>>, %arg15: memref<1x32xf32, #tpu.memory_space<vmem>>, %arg16: memref<1x32xf32, #tpu.memory_space<vmem>>, %arg17: memref<1x32xf32, #tpu.memory_space<vmem>>, %arg18: memref<1x8x32xbf16, #tpu.memory_space<vmem>>, %arg19: memref<8x32xbf16, #tpu.memory_space<vmem>>, %arg20: memref<8x32xbf16, #tpu.memory_space<vmem>>, %arg21: memref<8x32xf32, #tpu.memory_space<vmem>>) attributes {dimension_semantics = [#tpu.dimension_semantics<parallel>, #tpu.dimension_semantics<arbitrary>], iteration_bounds = array<i64: 2, 1>, scalar_prefetch = 0 : i64, scratch_operands = 3 : i64, tpu.core_type = #tpu.core_type<tc>, window_params = [{transform_indices = @transform_0, window_bounds = array<i64: 1, 8, 32>}, {transform_indices = @transform_1, window_bounds = array<i64: 1, 1, 8>}, {pipeline_mode = #tpu.pipeline_mode<synchronous>, transform_indices = @transform_2, window_bounds = array<i64: 32, 32>}, {pipeline_mode = #tpu.pipeline_mode<synchronous>, transform_indices = @transform_3, window_bounds = array<i64: 1, 32>}, {pipeline_mode = #tpu.pipeline_mode<synchronous>, transform_indices = @transform_4, window_bounds = array<i64: 32, 64>}, {pipeline_mode = #tpu.pipeline_mode<synchronous>, transform_indices = @transform_5, window_bounds = array<i64: 1, 64>}, {pipeline_mode = #tpu.pipeline_mode<synchronous>, transform_indices = @transform_6, window_bounds = array<i64: 32, 32>}, {pipeline_mode = #tpu.pipeline_mode<synchronous>, transform_indices = @transform_7, window_bounds = array<i64: 1, 32>}, {pipeline_mode = #tpu.pipeline_mode<synchronous>, transform_indices = @transform_8, window_bounds = array<i64: 1, 32>}, {pipeline_mode = #tpu.pipeline_mode<synchronous>, transform_indices = @transform_9, window_bounds = array<i64: 1, 32>}, {pipeline_mode = #tpu.pipeline_mode<synchronous>, transform_indices = @transform_10, window_bounds = array<i64: 32, 128>}, {pipeline_mode = #tpu.pipeline_mode<synchronous>, transform_indices = @transform_11, window_bounds = array<i64: 1, 128>}, {pipeline_mode = #tpu.pipeline_mode<synchronous>, transform_indices = @transform_12, window_bounds = array<i64: 128, 32>}, {pipeline_mode = #tpu.pipeline_mode<synchronous>, transform_indices = @transform_13, window_bounds = array<i64: 1, 32>}, {pipeline_mode = #tpu.pipeline_mode<synchronous>, transform_indices = @transform_14, window_bounds = array<i64: 1, 32>}, {pipeline_mode = #tpu.pipeline_mode<synchronous>, transform_indices = @transform_15, window_bounds = array<i64: 1, 32>}, {transform_indices = @transform_16, window_bounds = array<i64: 1, 8, 32>}]} {
    %c0_i32 = arith.constant 0 : i32
    %0 = arith.cmpi eq, %arg1, %c0_i32 : i32
    %1 = arith.extui %0 : i1 to i32
    %c0_i32_0 = arith.constant 0 : i32
    %2 = arith.cmpi ne, %1, %c0_i32_0 : i32
    scf.if %2 {
      %c0_117 = arith.constant 0 : index
      %c0_118 = arith.constant 0 : index
      %c0_119 = arith.constant 0 : index
      %199 = vector.load %arg2[%c0_117, %c0_118, %c0_119] : memref<1x8x32xbf16, #tpu.memory_space<vmem>>, vector<1x8x32xbf16>
      %200 = vector.shape_cast %199 : vector<1x8x32xbf16> to vector<8x32xbf16>
      %c0_120 = arith.constant 0 : index
      %c0_121 = arith.constant 0 : index
      %201 = vector.load %arg6[%c0_120, %c0_121] : memref<32x64xbf16, #tpu.memory_space<vmem>>, vector<32x64xbf16>
      %cst_122 = arith.constant dense<0.000000e+00> : vector<8x64xf32>
      %202 = tpu.matmul %200, %201, %cst_122 {dimension_numbers = #tpu.dot_dimension_numbers<[1], [0], [0], [1], [0, 0, 1, 1], [], []>} : vector<8x32xbf16>, vector<32x64xbf16>, vector<8x64xf32> -> vector<8x64xf32>
      %c0_123 = arith.constant 0 : index
      %c0_124 = arith.constant 0 : index
      %203 = vector.load %arg7[%c0_123, %c0_124] : memref<1x64xf32, #tpu.memory_space<vmem>>, vector<1x64xf32>
      %204 = vector.broadcast %203 : vector<1x64xf32> to vector<8x64xf32>
      %205 = arith.addf %202, %204 : vector<8x64xf32>
      %206 = vector.extract_strided_slice %205 {offsets = [0, 0], sizes = [8, 32], strides = [1, 1]} : vector<8x64xf32> to vector<8x32xf32>
      %207 = arith.truncf %206 : vector<8x32xf32> to vector<8x32xbf16>
      %c0_125 = arith.constant 0 : index
      %c0_126 = arith.constant 0 : index
      %208 = vector.load %arg19[%c0_125, %c0_126] : memref<8x32xbf16, #tpu.memory_space<vmem>>, vector<8x32xbf16>
      tpu.vector_store %arg19[%c0_125, %c0_126], %207 {strides = array<i32>} : memref<8x32xbf16, #tpu.memory_space<vmem>>, vector<8x32xbf16>,
      %209 = vector.extract_strided_slice %205 {offsets = [0, 32], sizes = [8, 32], strides = [1, 1]} : vector<8x64xf32> to vector<8x32xf32>
      %210 = arith.truncf %209 : vector<8x32xf32> to vector<8x32xbf16>
      %c0_127 = arith.constant 0 : index
      %c0_128 = arith.constant 0 : index
      %211 = vector.load %arg20[%c0_127, %c0_128] : memref<8x32xbf16, #tpu.memory_space<vmem>>, vector<8x32xbf16>
      tpu.vector_store %arg20[%c0_127, %c0_128], %210 {strides = array<i32>} : memref<8x32xbf16, #tpu.memory_space<vmem>>, vector<8x32xbf16>,
    } else {
    }
    %c8_i32 = arith.constant 8 : i32
    %3 = arith.muli %arg1, %c8_i32 : i32
    %4 = tpu.assume_multiple %3, 8 : i32
    %c0 = arith.constant 0 : index
    %5 = arith.index_cast %4 : i32 to index
    %c0_1 = arith.constant 0 : index
    %6 = vector.load %arg2[%c0, %5, %c0_1] : memref<1x8x32xbf16, #tpu.memory_space<vmem>>, vector<1x8x32xbf16>
    %7 = vector.shape_cast %6 : vector<1x8x32xbf16> to vector<8x32xbf16>
    %8 = arith.extf %7 : vector<8x32xbf16> to vector<8x32xf32>
    %c0_2 = arith.constant 0 : index
    %c0_3 = arith.constant 0 : index
    %c0_4 = arith.constant 0 : index
    %9 = vector.load %arg3[%c0_2, %c0_3, %c0_4] : memref<1x1x8xf32, #tpu.memory_space<vmem>>, vector<1x1x8xf32>
    %10 = vector.shape_cast %9 : vector<1x1x8xf32> to vector<1x8xf32>
    %cst = arith.constant 1.000000e+00 : f32
    %11 = vector.broadcast %cst : f32 to vector<1x8xf32>
    %12 = arith.subf %10, %11 : vector<1x8xf32>
    %cst_5 = arith.constant 1.000000e+09 : f32
    %13 = vector.broadcast %cst_5 : f32 to vector<1x8xf32>
    %14 = arith.mulf %12, %13 : vector<1x8xf32>
    %c0_6 = arith.constant 0 : index
    %c0_7 = arith.constant 0 : index
    %15 = vector.load %arg4[%c0_6, %c0_7] : memref<32x32xbf16, #tpu.memory_space<vmem>>, vector<32x32xbf16>
    %cst_8 = arith.constant dense<0.000000e+00> : vector<8x32xf32>
    %16 = tpu.matmul %7, %15, %cst_8 {dimension_numbers = #tpu.dot_dimension_numbers<[1], [0], [0], [1], [0, 0, 1, 1], [], []>} : vector<8x32xbf16>, vector<32x32xbf16>, vector<8x32xf32> -> vector<8x32xf32>
    %c0_9 = arith.constant 0 : index
    %c0_10 = arith.constant 0 : index
    %17 = vector.load %arg5[%c0_9, %c0_10] : memref<1x32xf32, #tpu.memory_space<vmem>>, vector<1x32xf32>
    %18 = vector.broadcast %17 : vector<1x32xf32> to vector<8x32xf32>
    %19 = arith.addf %16, %18 : vector<8x32xf32>
    %cst_11 = arith.constant 0.353553385 : f32
    %20 = vector.broadcast %cst_11 : f32 to vector<8x32xf32>
    %21 = arith.mulf %19, %20 : vector<8x32xf32>
    %22 = arith.truncf %21 : vector<8x32xf32> to vector<8x32xbf16>
    %cst_12 = arith.constant 0.000000e+00 : f32
    %23 = vector.broadcast %cst_12 : f32 to vector<8x32xf32>
    %c0_13 = arith.constant 0 : index
    %c0_14 = arith.constant 0 : index
    %24 = vector.load %arg21[%c0_13, %c0_14] : memref<8x32xf32, #tpu.memory_space<vmem>>, vector<8x32xf32>
    tpu.vector_store %arg21[%c0_13, %c0_14], %23 {strides = array<i32>} : memref<8x32xf32, #tpu.memory_space<vmem>>, vector<8x32xf32>,
    %25 = vector.extract_strided_slice %22 {offsets = [0, 0], sizes = [8, 8], strides = [1, 1]} : vector<8x32xbf16> to vector<8x8xbf16>
    %c0_15 = arith.constant 0 : index
    %c0_16 = arith.constant 0 : index
    %26 = vector.load %arg19[%c0_15, %c0_16] : memref<8x32xbf16, #tpu.memory_space<vmem>>, vector<8x8xbf16>
    %c0_17 = arith.constant 0 : index
    %c0_18 = arith.constant 0 : index
    %27 = vector.load %arg20[%c0_17, %c0_18] : memref<8x32xbf16, #tpu.memory_space<vmem>>, vector<8x8xbf16>
    %cst_19 = arith.constant dense<0.000000e+00> : vector<8x8xf32>
    %28 = tpu.matmul %25, %26, %cst_19 {dimension_numbers = #tpu.dot_dimension_numbers<[1], [1], [0], [0], [0, 0, 1, 0], [], []>} : vector<8x8xbf16>, vector<8x8xbf16>, vector<8x8xf32> -> vector<8x8xf32>
    %29 = vector.broadcast %14 : vector<1x8xf32> to vector<8x8xf32>
    %30 = arith.addf %28, %29 : vector<8x8xf32>
    %cst_20 = arith.constant dense<0xFF800000> : vector<8xf32>
    %31 = vector.multi_reduction <maximumf>, %30, %cst_20 [1] : vector<8x8xf32> to vector<8xf32>
    %32 = vector.shape_cast %31 : vector<8xf32> to vector<8x1xf32>
    %33 = vector.broadcast %32 : vector<8x1xf32> to vector<8x8xf32>
    %34 = arith.subf %30, %33 : vector<8x8xf32>
    %35 = math.exp %34 : vector<8x8xf32>
    %cst_21 = arith.constant dense<0.000000e+00> : vector<8xf32>
    %36 = vector.multi_reduction <add>, %35, %cst_21 [1] : vector<8x8xf32> to vector<8xf32>
    %37 = vector.shape_cast %36 : vector<8xf32> to vector<8x1xf32>
    %38 = arith.truncf %35 : vector<8x8xf32> to vector<8x8xbf16>
    %cst_22 = arith.constant dense<0.000000e+00> : vector<8x8xf32>
    %39 = tpu.matmul %38, %27, %cst_22 {dimension_numbers = #tpu.dot_dimension_numbers<[1], [0], [0], [1], [0, 0, 1, 1], [], []>} : vector<8x8xbf16>, vector<8x8xbf16>, vector<8x8xf32> -> vector<8x8xf32>
    %40 = tpu.reciprocal %37 {approx = true} : vector<8x1xf32> -> vector<8x1xf32>
    %41 = vector.broadcast %40 : vector<8x1xf32> to vector<8x8xf32>
    %42 = arith.mulf %39, %41 : vector<8x8xf32>
    %c0_23 = arith.constant 0 : index
    %c0_24 = arith.constant 0 : index
    %43 = vector.load %arg21[%c0_23, %c0_24] : memref<8x32xf32, #tpu.memory_space<vmem>>, vector<8x32xf32>
    %44 = arith.truncf %42 : vector<8x8xf32> to vector<8x8xbf16>
    %c0_25 = arith.constant 0 : index
    %c0_26 = arith.constant 0 : index
    %45 = vector.load %arg8[%c0_25, %c0_26] : memref<32x32xbf16, #tpu.memory_space<vmem>>, vector<8x32xbf16>
    %cst_27 = arith.constant dense<0.000000e+00> : vector<8x32xf32>
    %46 = tpu.matmul %44, %45, %cst_27 {dimension_numbers = #tpu.dot_dimension_numbers<[1], [0], [0], [1], [0, 0, 1, 1], [], []>} : vector<8x8xbf16>, vector<8x32xbf16>, vector<8x32xf32> -> vector<8x32xf32>
    %47 = arith.addf %43, %46 : vector<8x32xf32>
    %c0_28 = arith.constant 0 : index
    %c0_29 = arith.constant 0 : index
    %48 = vector.load %arg21[%c0_28, %c0_29] : memref<8x32xf32, #tpu.memory_space<vmem>>, vector<8x32xf32>
    tpu.vector_store %arg21[%c0_28, %c0_29], %47 {strides = array<i32>} : memref<8x32xf32, #tpu.memory_space<vmem>>, vector<8x32xf32>,
    %49 = vector.extract_strided_slice %22 {offsets = [0, 8], sizes = [8, 8], strides = [1, 1]} : vector<8x32xbf16> to vector<8x8xbf16>
    %c0_30 = arith.constant 0 : index
    %c8 = arith.constant 8 : index
    %50 = vector.load %arg19[%c0_30, %c8] : memref<8x32xbf16, #tpu.memory_space<vmem>>, vector<8x8xbf16>
    %c0_31 = arith.constant 0 : index
    %c8_32 = arith.constant 8 : index
    %51 = vector.load %arg20[%c0_31, %c8_32] : memref<8x32xbf16, #tpu.memory_space<vmem>>, vector<8x8xbf16>
    %cst_33 = arith.constant dense<0.000000e+00> : vector<8x8xf32>
    %52 = tpu.matmul %49, %50, %cst_33 {dimension_numbers = #tpu.dot_dimension_numbers<[1], [1], [0], [0], [0, 0, 1, 0], [], []>} : vector<8x8xbf16>, vector<8x8xbf16>, vector<8x8xf32> -> vector<8x8xf32>
    %53 = vector.broadcast %14 : vector<1x8xf32> to vector<8x8xf32>
    %54 = arith.addf %52, %53 : vector<8x8xf32>
    %cst_34 = arith.constant dense<0xFF800000> : vector<8xf32>
    %55 = vector.multi_reduction <maximumf>, %54, %cst_34 [1] : vector<8x8xf32> to vector<8xf32>
    %56 = vector.shape_cast %55 : vector<8xf32> to vector<8x1xf32>
    %57 = vector.broadcast %56 : vector<8x1xf32> to vector<8x8xf32>
    %58 = arith.subf %54, %57 : vector<8x8xf32>
    %59 = math.exp %58 : vector<8x8xf32>
    %cst_35 = arith.constant dense<0.000000e+00> : vector<8xf32>
    %60 = vector.multi_reduction <add>, %59, %cst_35 [1] : vector<8x8xf32> to vector<8xf32>
    %61 = vector.shape_cast %60 : vector<8xf32> to vector<8x1xf32>
    %62 = arith.truncf %59 : vector<8x8xf32> to vector<8x8xbf16>
    %cst_36 = arith.constant dense<0.000000e+00> : vector<8x8xf32>
    %63 = tpu.matmul %62, %51, %cst_36 {dimension_numbers = #tpu.dot_dimension_numbers<[1], [0], [0], [1], [0, 0, 1, 1], [], []>} : vector<8x8xbf16>, vector<8x8xbf16>, vector<8x8xf32> -> vector<8x8xf32>
    %64 = tpu.reciprocal %61 {approx = true} : vector<8x1xf32> -> vector<8x1xf32>
    %65 = vector.broadcast %64 : vector<8x1xf32> to vector<8x8xf32>
    %66 = arith.mulf %63, %65 : vector<8x8xf32>
    %c0_37 = arith.constant 0 : index
    %c0_38 = arith.constant 0 : index
    %67 = vector.load %arg21[%c0_37, %c0_38] : memref<8x32xf32, #tpu.memory_space<vmem>>, vector<8x32xf32>
    %68 = arith.truncf %66 : vector<8x8xf32> to vector<8x8xbf16>
    %c8_39 = arith.constant 8 : index
    %c0_40 = arith.constant 0 : index
    %69 = vector.load %arg8[%c8_39, %c0_40] : memref<32x32xbf16, #tpu.memory_space<vmem>>, vector<8x32xbf16>
    %cst_41 = arith.constant dense<0.000000e+00> : vector<8x32xf32>
    %70 = tpu.matmul %68, %69, %cst_41 {dimension_numbers = #tpu.dot_dimension_numbers<[1], [0], [0], [1], [0, 0, 1, 1], [], []>} : vector<8x8xbf16>, vector<8x32xbf16>, vector<8x32xf32> -> vector<8x32xf32>
    %71 = arith.addf %67, %70 : vector<8x32xf32>
    %c0_42 = arith.constant 0 : index
    %c0_43 = arith.constant 0 : index
    %72 = vector.load %arg21[%c0_42, %c0_43] : memref<8x32xf32, #tpu.memory_space<vmem>>, vector<8x32xf32>
    tpu.vector_store %arg21[%c0_42, %c0_43], %71 {strides = array<i32>} : memref<8x32xf32, #tpu.memory_space<vmem>>, vector<8x32xf32>,
    %73 = vector.extract_strided_slice %22 {offsets = [0, 16], sizes = [8, 8], strides = [1, 1]} : vector<8x32xbf16> to vector<8x8xbf16>
    %c0_44 = arith.constant 0 : index
    %c16 = arith.constant 16 : index
    %74 = vector.load %arg19[%c0_44, %c16] : memref<8x32xbf16, #tpu.memory_space<vmem>>, vector<8x8xbf16>
    %c0_45 = arith.constant 0 : index
    %c16_46 = arith.constant 16 : index
    %75 = vector.load %arg20[%c0_45, %c16_46] : memref<8x32xbf16, #tpu.memory_space<vmem>>, vector<8x8xbf16>
    %cst_47 = arith.constant dense<0.000000e+00> : vector<8x8xf32>
    %76 = tpu.matmul %73, %74, %cst_47 {dimension_numbers = #tpu.dot_dimension_numbers<[1], [1], [0], [0], [0, 0, 1, 0], [], []>} : vector<8x8xbf16>, vector<8x8xbf16>, vector<8x8xf32> -> vector<8x8xf32>
    %77 = vector.broadcast %14 : vector<1x8xf32> to vector<8x8xf32>
    %78 = arith.addf %76, %77 : vector<8x8xf32>
    %cst_48 = arith.constant dense<0xFF800000> : vector<8xf32>
    %79 = vector.multi_reduction <maximumf>, %78, %cst_48 [1] : vector<8x8xf32> to vector<8xf32>
    %80 = vector.shape_cast %79 : vector<8xf32> to vector<8x1xf32>
    %81 = vector.broadcast %80 : vector<8x1xf32> to vector<8x8xf32>
    %82 = arith.subf %78, %81 : vector<8x8xf32>
    %83 = math.exp %82 : vector<8x8xf32>
    %cst_49 = arith.constant dense<0.000000e+00> : vector<8xf32>
    %84 = vector.multi_reduction <add>, %83, %cst_49 [1] : vector<8x8xf32> to vector<8xf32>
    %85 = vector.shape_cast %84 : vector<8xf32> to vector<8x1xf32>
    %86 = arith.truncf %83 : vector<8x8xf32> to vector<8x8xbf16>
    %cst_50 = arith.constant dense<0.000000e+00> : vector<8x8xf32>
    %87 = tpu.matmul %86, %75, %cst_50 {dimension_numbers = #tpu.dot_dimension_numbers<[1], [0], [0], [1], [0, 0, 1, 1], [], []>} : vector<8x8xbf16>, vector<8x8xbf16>, vector<8x8xf32> -> vector<8x8xf32>
    %88 = tpu.reciprocal %85 {approx = true} : vector<8x1xf32> -> vector<8x1xf32>
    %89 = vector.broadcast %88 : vector<8x1xf32> to vector<8x8xf32>
    %90 = arith.mulf %87, %89 : vector<8x8xf32>
    %c0_51 = arith.constant 0 : index
    %c0_52 = arith.constant 0 : index
    %91 = vector.load %arg21[%c0_51, %c0_52] : memref<8x32xf32, #tpu.memory_space<vmem>>, vector<8x32xf32>
    %92 = arith.truncf %90 : vector<8x8xf32> to vector<8x8xbf16>
    %c16_53 = arith.constant 16 : index
    %c0_54 = arith.constant 0 : index
    %93 = vector.load %arg8[%c16_53, %c0_54] : memref<32x32xbf16, #tpu.memory_space<vmem>>, vector<8x32xbf16>
    %cst_55 = arith.constant dense<0.000000e+00> : vector<8x32xf32>
    %94 = tpu.matmul %92, %93, %cst_55 {dimension_numbers = #tpu.dot_dimension_numbers<[1], [0], [0], [1], [0, 0, 1, 1], [], []>} : vector<8x8xbf16>, vector<8x32xbf16>, vector<8x32xf32> -> vector<8x32xf32>
    %95 = arith.addf %91, %94 : vector<8x32xf32>
    %c0_56 = arith.constant 0 : index
    %c0_57 = arith.constant 0 : index
    %96 = vector.load %arg21[%c0_56, %c0_57] : memref<8x32xf32, #tpu.memory_space<vmem>>, vector<8x32xf32>
    tpu.vector_store %arg21[%c0_56, %c0_57], %95 {strides = array<i32>} : memref<8x32xf32, #tpu.memory_space<vmem>>, vector<8x32xf32>,
    %97 = vector.extract_strided_slice %22 {offsets = [0, 24], sizes = [8, 8], strides = [1, 1]} : vector<8x32xbf16> to vector<8x8xbf16>
    %c0_58 = arith.constant 0 : index
    %c24 = arith.constant 24 : index
    %98 = vector.load %arg19[%c0_58, %c24] : memref<8x32xbf16, #tpu.memory_space<vmem>>, vector<8x8xbf16>
    %c0_59 = arith.constant 0 : index
    %c24_60 = arith.constant 24 : index
    %99 = vector.load %arg20[%c0_59, %c24_60] : memref<8x32xbf16, #tpu.memory_space<vmem>>, vector<8x8xbf16>
    %cst_61 = arith.constant dense<0.000000e+00> : vector<8x8xf32>
    %100 = tpu.matmul %97, %98, %cst_61 {dimension_numbers = #tpu.dot_dimension_numbers<[1], [1], [0], [0], [0, 0, 1, 0], [], []>} : vector<8x8xbf16>, vector<8x8xbf16>, vector<8x8xf32> -> vector<8x8xf32>
    %101 = vector.broadcast %14 : vector<1x8xf32> to vector<8x8xf32>
    %102 = arith.addf %100, %101 : vector<8x8xf32>
    %cst_62 = arith.constant dense<0xFF800000> : vector<8xf32>
    %103 = vector.multi_reduction <maximumf>, %102, %cst_62 [1] : vector<8x8xf32> to vector<8xf32>
    %104 = vector.shape_cast %103 : vector<8xf32> to vector<8x1xf32>
    %105 = vector.broadcast %104 : vector<8x1xf32> to vector<8x8xf32>
    %106 = arith.subf %102, %105 : vector<8x8xf32>
    %107 = math.exp %106 : vector<8x8xf32>
    %cst_63 = arith.constant dense<0.000000e+00> : vector<8xf32>
    %108 = vector.multi_reduction <add>, %107, %cst_63 [1] : vector<8x8xf32> to vector<8xf32>
    %109 = vector.shape_cast %108 : vector<8xf32> to vector<8x1xf32>
    %110 = arith.truncf %107 : vector<8x8xf32> to vector<8x8xbf16>
    %cst_64 = arith.constant dense<0.000000e+00> : vector<8x8xf32>
    %111 = tpu.matmul %110, %99, %cst_64 {dimension_numbers = #tpu.dot_dimension_numbers<[1], [0], [0], [1], [0, 0, 1, 1], [], []>} : vector<8x8xbf16>, vector<8x8xbf16>, vector<8x8xf32> -> vector<8x8xf32>
    %112 = tpu.reciprocal %109 {approx = true} : vector<8x1xf32> -> vector<8x1xf32>
    %113 = vector.broadcast %112 : vector<8x1xf32> to vector<8x8xf32>
    %114 = arith.mulf %111, %113 : vector<8x8xf32>
    %c0_65 = arith.constant 0 : index
    %c0_66 = arith.constant 0 : index
    %115 = vector.load %arg21[%c0_65, %c0_66] : memref<8x32xf32, #tpu.memory_space<vmem>>, vector<8x32xf32>
    %116 = arith.truncf %114 : vector<8x8xf32> to vector<8x8xbf16>
    %c24_67 = arith.constant 24 : index
    %c0_68 = arith.constant 0 : index
    %117 = vector.load %arg8[%c24_67, %c0_68] : memref<32x32xbf16, #tpu.memory_space<vmem>>, vector<8x32xbf16>
    %cst_69 = arith.constant dense<0.000000e+00> : vector<8x32xf32>
    %118 = tpu.matmul %116, %117, %cst_69 {dimension_numbers = #tpu.dot_dimension_numbers<[1], [0], [0], [1], [0, 0, 1, 1], [], []>} : vector<8x8xbf16>, vector<8x32xbf16>, vector<8x32xf32> -> vector<8x32xf32>
    %119 = arith.addf %115, %118 : vector<8x32xf32>
    %c0_70 = arith.constant 0 : index
    %c0_71 = arith.constant 0 : index
    %120 = vector.load %arg21[%c0_70, %c0_71] : memref<8x32xf32, #tpu.memory_space<vmem>>, vector<8x32xf32>
    tpu.vector_store %arg21[%c0_70, %c0_71], %119 {strides = array<i32>} : memref<8x32xf32, #tpu.memory_space<vmem>>, vector<8x32xf32>,
    %c0_72 = arith.constant 0 : index
    %c0_73 = arith.constant 0 : index
    %121 = vector.load %arg21[%c0_72, %c0_73] : memref<8x32xf32, #tpu.memory_space<vmem>>, vector<8x32xf32>
    %c0_74 = arith.constant 0 : index
    %c0_75 = arith.constant 0 : index
    %122 = vector.load %arg9[%c0_74, %c0_75] : memref<1x32xf32, #tpu.memory_space<vmem>>, vector<1x32xf32>
    %123 = vector.broadcast %122 : vector<1x32xf32> to vector<8x32xf32>
    %124 = arith.addf %121, %123 : vector<8x32xf32>
    %125 = arith.addf %8, %124 : vector<8x32xf32>
    %cst_76 = arith.constant dense<0.000000e+00> : vector<8xf32>
    %126 = vector.multi_reduction <add>, %125, %cst_76 [1] : vector<8x32xf32> to vector<8xf32>
    %127 = vector.shape_cast %126 : vector<8xf32> to vector<8x1xf32>
    %cst_77 = arith.constant 3.200000e+01 : f32
    %128 = vector.broadcast %cst_77 : f32 to vector<8x1xf32>
    %129 = arith.divf %127, %128 : vector<8x1xf32>
    %130 = vector.broadcast %129 : vector<8x1xf32> to vector<8x32xf32>
    %131 = arith.subf %125, %130 : vector<8x32xf32>
    %132 = arith.mulf %131, %131 : vector<8x32xf32>
    %cst_78 = arith.constant dense<0.000000e+00> : vector<8xf32>
    %133 = vector.multi_reduction <add>, %132, %cst_78 [1] : vector<8x32xf32> to vector<8xf32>
    %134 = vector.shape_cast %133 : vector<8xf32> to vector<8x1xf32>
    %cst_79 = arith.constant 3.200000e+01 : f32
    %135 = vector.broadcast %cst_79 : f32 to vector<8x1xf32>
    %136 = arith.divf %134, %135 : vector<8x1xf32>
    %137 = vector.broadcast %129 : vector<8x1xf32> to vector<8x32xf32>
    %138 = arith.subf %125, %137 : vector<8x32xf32>
    %cst_80 = arith.constant 9.99999974E-6 : f32
    %139 = vector.broadcast %cst_80 : f32 to vector<8x1xf32>
    %140 = arith.addf %136, %139 : vector<8x1xf32>
    %141 = math.rsqrt %140 : vector<8x1xf32>
    %142 = vector.broadcast %141 : vector<8x1xf32> to vector<8x32xf32>
    %143 = arith.mulf %138, %142 : vector<8x32xf32>
    %c0_81 = arith.constant 0 : index
    %c0_82 = arith.constant 0 : index
    %144 = vector.load %arg10[%c0_81, %c0_82] : memref<1x32xf32, #tpu.memory_space<vmem>>, vector<1x32xf32>
    %145 = vector.broadcast %144 : vector<1x32xf32> to vector<8x32xf32>
    %146 = arith.mulf %143, %145 : vector<8x32xf32>
    %c0_83 = arith.constant 0 : index
    %c0_84 = arith.constant 0 : index
    %147 = vector.load %arg11[%c0_83, %c0_84] : memref<1x32xf32, #tpu.memory_space<vmem>>, vector<1x32xf32>
    %148 = vector.broadcast %147 : vector<1x32xf32> to vector<8x32xf32>
    %149 = arith.addf %146, %148 : vector<8x32xf32>
    %150 = arith.truncf %149 : vector<8x32xf32> to vector<8x32xbf16>
    %cst_85 = arith.constant 0.000000e+00 : f32
    %151 = vector.broadcast %cst_85 : f32 to vector<8x32xf32>
    %c0_86 = arith.constant 0 : index
    %c0_87 = arith.constant 0 : index
    %152 = vector.load %arg21[%c0_86, %c0_87] : memref<8x32xf32, #tpu.memory_space<vmem>>, vector<8x32xf32>
    tpu.vector_store %arg21[%c0_86, %c0_87], %151 {strides = array<i32>} : memref<8x32xf32, #tpu.memory_space<vmem>>, vector<8x32xf32>,
    %c0_88 = arith.constant 0 : index
    %c0_89 = arith.constant 0 : index
    %153 = vector.load %arg12[%c0_88, %c0_89] : memref<32x128xbf16, #tpu.memory_space<vmem>>, vector<32x128xbf16>
    %cst_90 = arith.constant dense<0.000000e+00> : vector<8x128xf32>
    %154 = tpu.matmul %150, %153, %cst_90 {dimension_numbers = #tpu.dot_dimension_numbers<[1], [0], [0], [1], [0, 0, 1, 1], [], []>} : vector<8x32xbf16>, vector<32x128xbf16>, vector<8x128xf32> -> vector<8x128xf32>
    %c0_91 = arith.constant 0 : index
    %c0_92 = arith.constant 0 : index
    %155 = vector.load %arg13[%c0_91, %c0_92] : memref<1x128xf32, #tpu.memory_space<vmem>>, vector<1x128xf32>
    %156 = vector.broadcast %155 : vector<1x128xf32> to vector<8x128xf32>
    %157 = arith.addf %154, %156 : vector<8x128xf32>
    %cst_93 = arith.constant 0.000000e+00 : f32
    %158 = vector.broadcast %cst_93 : f32 to vector<8x128xf32>
    %159 = arith.maximumf %157, %158 : vector<8x128xf32>
    %160 = arith.truncf %159 : vector<8x128xf32> to vector<8x128xbf16>
    %c0_94 = arith.constant 0 : index
    %c0_95 = arith.constant 0 : index
    %161 = vector.load %arg21[%c0_94, %c0_95] : memref<8x32xf32, #tpu.memory_space<vmem>>, vector<8x32xf32>
    %c0_96 = arith.constant 0 : index
    %c0_97 = arith.constant 0 : index
    %162 = vector.load %arg14[%c0_96, %c0_97] : memref<128x32xbf16, #tpu.memory_space<vmem>>, vector<128x32xbf16>
    %cst_98 = arith.constant dense<0.000000e+00> : vector<8x32xf32>
    %163 = tpu.matmul %160, %162, %cst_98 {dimension_numbers = #tpu.dot_dimension_numbers<[1], [0], [0], [1], [0, 0, 1, 1], [], []>} : vector<8x128xbf16>, vector<128x32xbf16>, vector<8x32xf32> -> vector<8x32xf32>
    %164 = arith.addf %161, %163 : vector<8x32xf32>
    %c0_99 = arith.constant 0 : index
    %c0_100 = arith.constant 0 : index
    %165 = vector.load %arg21[%c0_99, %c0_100] : memref<8x32xf32, #tpu.memory_space<vmem>>, vector<8x32xf32>
    tpu.vector_store %arg21[%c0_99, %c0_100], %164 {strides = array<i32>} : memref<8x32xf32, #tpu.memory_space<vmem>>, vector<8x32xf32>,
    %c0_101 = arith.constant 0 : index
    %c0_102 = arith.constant 0 : index
    %166 = vector.load %arg21[%c0_101, %c0_102] : memref<8x32xf32, #tpu.memory_space<vmem>>, vector<8x32xf32>
    %c0_103 = arith.constant 0 : index
    %c0_104 = arith.constant 0 : index
    %167 = vector.load %arg15[%c0_103, %c0_104] : memref<1x32xf32, #tpu.memory_space<vmem>>, vector<1x32xf32>
    %168 = vector.broadcast %167 : vector<1x32xf32> to vector<8x32xf32>
    %169 = arith.addf %166, %168 : vector<8x32xf32>
    %170 = arith.addf %149, %169 : vector<8x32xf32>
    %cst_105 = arith.constant dense<0.000000e+00> : vector<8xf32>
    %171 = vector.multi_reduction <add>, %170, %cst_105 [1] : vector<8x32xf32> to vector<8xf32>
    %172 = vector.shape_cast %171 : vector<8xf32> to vector<8x1xf32>
    %cst_106 = arith.constant 3.200000e+01 : f32
    %173 = vector.broadcast %cst_106 : f32 to vector<8x1xf32>
    %174 = arith.divf %172, %173 : vector<8x1xf32>
    %175 = vector.broadcast %174 : vector<8x1xf32> to vector<8x32xf32>
    %176 = arith.subf %170, %175 : vector<8x32xf32>
    %177 = arith.mulf %176, %176 : vector<8x32xf32>
    %cst_107 = arith.constant dense<0.000000e+00> : vector<8xf32>
    %178 = vector.multi_reduction <add>, %177, %cst_107 [1] : vector<8x32xf32> to vector<8xf32>
    %179 = vector.shape_cast %178 : vector<8xf32> to vector<8x1xf32>
    %cst_108 = arith.constant 3.200000e+01 : f32
    %180 = vector.broadcast %cst_108 : f32 to vector<8x1xf32>
    %181 = arith.divf %179, %180 : vector<8x1xf32>
    %182 = vector.broadcast %174 : vector<8x1xf32> to vector<8x32xf32>
    %183 = arith.subf %170, %182 : vector<8x32xf32>
    %cst_109 = arith.constant 9.99999974E-6 : f32
    %184 = vector.broadcast %cst_109 : f32 to vector<8x1xf32>
    %185 = arith.addf %181, %184 : vector<8x1xf32>
    %186 = math.rsqrt %185 : vector<8x1xf32>
    %187 = vector.broadcast %186 : vector<8x1xf32> to vector<8x32xf32>
    %188 = arith.mulf %183, %187 : vector<8x32xf32>
    %c0_110 = arith.constant 0 : index
    %c0_111 = arith.constant 0 : index
    %189 = vector.load %arg16[%c0_110, %c0_111] : memref<1x32xf32, #tpu.memory_space<vmem>>, vector<1x32xf32>
    %190 = vector.broadcast %189 : vector<1x32xf32> to vector<8x32xf32>
    %191 = arith.mulf %188, %190 : vector<8x32xf32>
    %c0_112 = arith.constant 0 : index
    %c0_113 = arith.constant 0 : index
    %192 = vector.load %arg17[%c0_112, %c0_113] : memref<1x32xf32, #tpu.memory_space<vmem>>, vector<1x32xf32>
    %193 = vector.broadcast %192 : vector<1x32xf32> to vector<8x32xf32>
    %194 = arith.addf %191, %193 : vector<8x32xf32>
    %195 = arith.truncf %194 : vector<8x32xf32> to vector<8x32xbf16>
    %c0_114 = arith.constant 0 : index
    %c0_115 = arith.constant 0 : index
    %c0_116 = arith.constant 0 : index
    %196 = vector.load %arg18[%c0_114, %c0_115, %c0_116] : memref<1x8x32xbf16, #tpu.memory_space<vmem>>, vector<1x8x32xbf16>
    %197 = vector.shape_cast %196 : vector<1x8x32xbf16> to vector<8x32xbf16>
    %198 = vector.shape_cast %195 : vector<8x32xbf16> to vector<1x8x32xbf16>
    tpu.vector_store %arg18[%c0_114, %c0_115, %c0_116], %198 {strides = array<i32>} : memref<1x8x32xbf16, #tpu.memory_space<vmem>>, vector<1x8x32xbf16>,
    return
  }
  func.func @transform_0(%arg0: i32, %arg1: i32) -> (i32, i32, i32) {
    %c0_i32 = arith.constant 0 : i32
    %c0_i32_0 = arith.constant 0 : i32
    %c0_i32_1 = arith.constant 0 : i32
    return %arg0, %c0_i32, %c0_i32_0 : i32, i32, i32
  }
  func.func @transform_1(%arg0: i32, %arg1: i32) -> (i32, i32, i32) {
    %c0_i32 = arith.constant 0 : i32
    %c0_i32_0 = arith.constant 0 : i32
    %c0_i32_1 = arith.constant 0 : i32
    return %arg0, %c0_i32, %c0_i32_0 : i32, i32, i32
  }
  func.func @transform_2(%arg0: i32, %arg1: i32) -> (i32, i32) {
    %c0_i32 = arith.constant 0 : i32
    %c0_i32_0 = arith.constant 0 : i32
    %c0_i32_1 = arith.constant 0 : i32
    return %c0_i32, %c0_i32_0 : i32, i32
  }
  func.func @transform_3(%arg0: i32, %arg1: i32) -> (i32, i32) {
    %c0_i32 = arith.constant 0 : i32
    %c0_i32_0 = arith.constant 0 : i32
    %c0_i32_1 = arith.constant 0 : i32
    return %c0_i32, %c0_i32_0 : i32, i32
  }
  func.func @transform_4(%arg0: i32, %arg1: i32) -> (i32, i32) {
    %c0_i32 = arith.constant 0 : i32
    %c0_i32_0 = arith.constant 0 : i32
    %c0_i32_1 = arith.constant 0 : i32
    return %c0_i32, %c0_i32_0 : i32, i32
  }
  func.func @transform_5(%arg0: i32, %arg1: i32) -> (i32, i32) {
    %c0_i32 = arith.constant 0 : i32
    %c0_i32_0 = arith.constant 0 : i32
    %c0_i32_1 = arith.constant 0 : i32
    return %c0_i32, %c0_i32_0 : i32, i32
  }
  func.func @transform_6(%arg0: i32, %arg1: i32) -> (i32, i32) {
    %c0_i32 = arith.constant 0 : i32
    %c0_i32_0 = arith.constant 0 : i32
    %c0_i32_1 = arith.constant 0 : i32
    return %c0_i32, %c0_i32_0 : i32, i32
  }
  func.func @transform_7(%arg0: i32, %arg1: i32) -> (i32, i32) {
    %c0_i32 = arith.constant 0 : i32
    %c0_i32_0 = arith.constant 0 : i32
    %c0_i32_1 = arith.constant 0 : i32
    return %c0_i32, %c0_i32_0 : i32, i32
  }
  func.func @transform_8(%arg0: i32, %arg1: i32) -> (i32, i32) {
    %c0_i32 = arith.constant 0 : i32
    %c0_i32_0 = arith.constant 0 : i32
    %c0_i32_1 = arith.constant 0 : i32
    return %c0_i32, %c0_i32_0 : i32, i32
  }
  func.func @transform_9(%arg0: i32, %arg1: i32) -> (i32, i32) {
    %c0_i32 = arith.constant 0 : i32
    %c0_i32_0 = arith.constant 0 : i32
    %c0_i32_1 = arith.constant 0 : i32
    return %c0_i32, %c0_i32_0 : i32, i32
  }
  func.func @transform_10(%arg0: i32, %arg1: i32) -> (i32, i32) {
    %c0_i32 = arith.constant 0 : i32
    %c0_i32_0 = arith.constant 0 : i32
    %c0_i32_1 = arith.constant 0 : i32
    return %c0_i32, %c0_i32_0 : i32, i32
  }
  func.func @transform_11(%arg0: i32, %arg1: i32) -> (i32, i32) {
    %c0_i32 = arith.constant 0 : i32
    %c0_i32_0 = arith.constant 0 : i32
    %c0_i32_1 = arith.constant 0 : i32
    return %c0_i32, %c0_i32_0 : i32, i32
  }
  func.func @transform_12(%arg0: i32, %arg1: i32) -> (i32, i32) {
    %c0_i32 = arith.constant 0 : i32
    %c0_i32_0 = arith.constant 0 : i32
    %c0_i32_1 = arith.constant 0 : i32
    return %c0_i32, %c0_i32_0 : i32, i32
  }
  func.func @transform_13(%arg0: i32, %arg1: i32) -> (i32, i32) {
    %c0_i32 = arith.constant 0 : i32
    %c0_i32_0 = arith.constant 0 : i32
    %c0_i32_1 = arith.constant 0 : i32
    return %c0_i32, %c0_i32_0 : i32, i32
  }
  func.func @transform_14(%arg0: i32, %arg1: i32) -> (i32, i32) {
    %c0_i32 = arith.constant 0 : i32
    %c0_i32_0 = arith.constant 0 : i32
    %c0_i32_1 = arith.constant 0 : i32
    return %c0_i32, %c0_i32_0 : i32, i32
  }
  func.func @transform_15(%arg0: i32, %arg1: i32) -> (i32, i32) {
    %c0_i32 = arith.constant 0 : i32
    %c0_i32_0 = arith.constant 0 : i32
    %c0_i32_1 = arith.constant 0 : i32
    return %c0_i32, %c0_i32_0 : i32, i32
  }
  func.func @transform_16(%arg0: i32, %arg1: i32) -> (i32, i32, i32) {
    %c0_i32 = arith.constant 0 : i32
    %c0_i32_0 = arith.constant 0 : i32
    return %arg0, %arg1, %c0_i32 : i32, i32, i32
  }
}

</mosaic_0001>

<bundles_post_ra>
// kernel: tpu_custom_call.1
= control target key start
LH: loop header
LB: loop body
LE: loop exit
PB: predicated region body
PF: predicated region fallthrough
CT: control target
= control target key end

     0   :  { %s2557_s0 = inlined_call_operand.vmem [shape: bf16[2,8,32], index: 0, kind: input, shape index: {}]   ;;  %s2558_s1 = inlined_call_operand.vmem [shape: f32[2,1,8], index: 1, kind: input, shape index: {}]   ;;  %s2559_s2 = inlined_call_operand.vmem [shape: bf16[32,32], index: 2, kind: input, shape index: {}]   ;;  %s2560_s3 = inlined_call_operand.vmem [shape: f32[1,32], index: 3, kind: input, shape index: {}]   ;;  %s2561_s4 = inlined_call_operand.vmem [shape: bf16[32,64], index: 4, kind: input, shape index: {}]   ;;  %s2562_s5 = inlined_call_operand.vmem [shape: f32[1,64], index: 5, kind: input, shape index: {}]   ;;  %s2563_s6 = inlined_call_operand.vmem [shape: bf16[32,32], index: 6, kind: input, shape index: {}]   ;;  %s2564_s7 = inlined_call_operand.vmem [shape: f32[1,32], index: 7, kind: input, shape index: {}]   ;;  %s2565_s8 = inlined_call_operand.vmem [shape: f32[1,32], index: 8, kind: input, shape index: {}]   ;;  %s2566_s9 = inlined_call_operand.vmem [shape: f32[1,32], index: 9, kind: input, shape index: {}]   ;;  %s2567_s10 = inlined_call_operand.vmem [shape: bf16[32,128], index: 10, kind: input, shape index: {}]   ;;  %s2568_s11 = inlined_call_operand.vmem [shape: f32[1,128], index: 11, kind: input, shape index: {}]   ;;  %s2569_s12 = inlined_call_operand.vmem [shape: bf16[128,32], index: 12, kind: input, shape index: {}]   ;;  %s2570_s13 = inlined_call_operand.vmem [shape: f32[1,32], index: 13, kind: input, shape index: {}]   ;;  %s2571_s14 = inlined_call_operand.vmem [shape: f32[1,32], index: 14, kind: input, shape index: {}]   ;;  %s2572_s15 = inlined_call_operand.vmem [shape: f32[1,32], index: 15, kind: input, shape index: {}]   ;;  %s2573_s16 = inlined_call_operand.hbm [shape: bf16[2,8,32], index: 16, kind: output, shape index: {}]  }
   0x1   :  { %2577 = sst [smem:[#allocation12_spill]] %s2557_s0 }
   0x2   :  { %2578 = sst [smem:[#allocation13_spill]] %s2558_s1 }
   0x3   :  { %2579 = sst [smem:[#allocation14_spill]] %s2559_s2 }
   0x4   :  { %2580 = sst [smem:[#allocation15_spill]] %s2561_s4 }
   0x5   :  { %21 = vsyncpa [#allocation6], 0 }
   0x6   :  { %23 = vsyncpa [#allocation6 + $0x1], 0  ;;  %s2223_s21 = smov 0   ;;  %s2225_s22 = smov 0  }
   0x7   :  { %s2227_s23 = smov 0   ;;  %s2229_s24 = smov 0  }
   0x8   :  { %s2231_s25 = smov 0   ;;  %s2233_s26 = smov 0  }
   0x9 LB: > { %2581 = sst [smem:[#allocation8_spill]] %s2117_s23  ;;  %s1734_s27 = sadd.s32 4294967295, %s2129_s26   ;;  %s2129_s26 = sphi %s2233_s26, %s29_s26   ;;  %s2125_s25 = sphi %s2231_s25, %s2594_s25   ;;  %s2121_s24 = sphi %s2229_s24, %s2593_s24   ;;  %s2117_s23 = sphi %s2227_s23, %s2592_s23   ;;  %s2113_s22 = sphi %s2225_s22, %s2596_s22   ;;  %s2109_s21 = sphi %s2223_s21, %s2595_s21  }
   0xa   : > { %2582 = sst [smem:[#allocation9_spill]] %s2125_s25  ;;  %s1735_s28 = sadd.s32 4294967294, %s2129_s26  }
   0xb   : > { %s41_s29 = sadd.s32 1, %s2125_s25  ;;  %s396_s30 = sadd.s32 1, %s2117_s23 }
   0xc   : > { %p43_p0 = scmp.ge.s32.totalorder %s41_s29, 2  ;;  %p406_p1 = scmp.ne.s32.totalorder %s2117_s23, %s2113_s22 }
   0xd   : > { %p407_p2 = scmp.eq.s32.totalorder %s1734_s27, 1  ;;  %p412_p3 = scmp.ne.s32.totalorder %s2113_s22, %s2109_s21 }
   0xe   : > { %s2598_s29 = smov (%p43_p0, %s41_s29), 0  ;;  %p413_p5 = scmp.eq.s32.totalorder %s1735_s28, 1 }
   0xf   : > { %2583 = sst [smem:[#allocation10_spill]] %s2598_s29  ;;  %p2263_p4 = por %p407_p2, %p406_p1 }
  0x10   : > { %s391_s17 = ssub.s32 %s2125_s25, %s2598_s29  ;;  %p1738_p6 = scmp.ge.s32.totalorder %s2129_s26, 1 }
  0x11   : > { %p394_p7 = scmp.eq.s32.totalorder %s391_s17, 0  ;;  %p2270_p8 = por %p413_p5, %p412_p3 }
  0x12   : > { %p486_p9 = scmp.lt.s32.totalorder %s2129_s26, 3 }
  0x13   : > { %s2276_s19 = scalar_select %p394_p7, %s2117_s23, %s396_s30  }
  0x14   : > { %p487_p10 = pnand %p1738_p6, %p486_p9 }
  0x15   : > { %2586 = sst [smem:[#allocation11_spill]] %s2276_s19  ;;  %s2587_s4 = sld [smem:[#allocation15_spill]] (!%p487_p10)  ;;  %v2131_v1 = vmov (!%p487_p10), 0.0   ;;  %vm2132_vm0 = vmmov (!%p487_p10), 0   ;;  %vm574_vm1 = vcmask (!%p487_p10), 261120   ;;  %vm619_vm2 = vcmask (!%p487_p10), 257024  }
  0x16   : > { %490 = sbr.rel (%p487_p10) target bundleno = 3321 (0xcf9), region = 84  ;;  %1834 = vmatprep.subr.bf16.mxu0 (!%p487_p10), %v2131_v1  ;;  %1856 = vmatprep.subr.bf16.mxu1 (!%p487_p10), %v2131_v1  ;;  %p538_p11 = scmp.lt.s32.totalorder (!%p487_p10), %s2121_s24, 1  ;;  %707 = vst.msk [vmem:[#allocation4] sm:$0xff] (!%p487_p10), %vm574_vm1, %v2131_v1  ;;  %v1741_v7 = vld [vmem:[%s2562_s5] ss:$0 sm:$0xff] (!%p487_p10)  ;;  %vm716_vm3 = vcmask (!%p487_p10), 64512   ;;  %v711_v25 = vlaneseq (!%p487_p10) }
  0x17   : > { %1838 = vmatprep.mubr.msk.bf16.mxu0 (!%p487_p10), %vm2132_vm0, %v2131_v1  ;;  %1858 = vmatprep.mubr.msk.bf16.mxu1 (!%p487_p10), %vm2132_vm0, %v2131_v1  ;;  %s2588_s2 = sld [smem:[#allocation14_spill]] (!%p487_p10)  ;;  %s2589_s29 = sld [smem:[#allocation12_spill]] (!%p487_p10)  ;;  %v1747_v14 = vld [vmem:[%s2560_s3] ss:$0 sm:$0xff] (!%p487_p10)  ;;  %vm776_vm4 = vcmask (!%p487_p10), 1043456  }
  0x18   : > { %s2133_s19 = smov (!%p487_p10), 120   ;;  %s2590_s1 = sld [smem:[#allocation13_spill]] (!%p487_p10)  ;;  %v712_v28 = vshrl.u32 (!%p487_p10), %v711_v25, 7  ;;  %v824_v51 = vld [vmem:[%s2563_s6] sm:$0xf] (!%p487_p10) }
  0x19   : > { %s2134_s17 = smov (!%p487_p10), 96   ;;  %v829_v52 = vsel (!%p487_p10), %vm776_vm4, %v824_v51, 0  ;;  %s2136_s23 = smov (!%p487_p10), 104   ;;  %v994_v25 = vld [vmem:[%s2563_s6 + $0x4] sm:$0xf] (!%p487_p10) }
  0x1a   : > { %v713_v30 = vsub.s32 (!%p487_p10), 0, %v712_v28 }
  0x1b   : > { %v2011_v0 = vld [vmem:[%s2587_s4] sm:$0xff] (!%p487_p10)   ;;  %v2012_v2 = vld [vmem:[%s2587_s4 + $0x8] sm:$0xff] (!%p487_p10)  }
  0x1c   : > { %1835 = vmatpush3.bf16.msra.mxu0 (!%p487_p10), %v2011_v0 }
  0x1d   : > { %1836 = vmatprep.subr.bf16.mxu0 %v2131_v1  ;;  %s2295_s30 = scalar_select %p538_p11, %s2121_s24, 1  ;;  %v2013_v3 = vld [vmem:[%s2588_s2] sm:$0xff]   ;;  %v2014_v5 = vld [vmem:[%s2588_s2 + $0x8] sm:$0xff]  }
  0x1f   : > { %s1740_s20 = sshll.u32 %s2295_s30, 2  ;;  %s544_s28 = scalar_lea.vmem %s2590_s1, %s2295_s30 }
  0x20   : > { %1837 = vmatpush3.bf16.msra.mxu0 %v2012_v2  ;;  %s541_s25 = scalar_lea.vmem %s2589_s29, %s1740_s20  ;;  %v635_v26 = vld [vmem:[%s544_s28] sm:$0x1]  ;;  %s2135_s30 = smov 112  }
  0x21   : > { %1842 = vmatprep.subr.bf16.mxu0 %v2131_v1  ;;  %v550_v4 = vld [vmem:[%s541_s25] sm:$0xf]  ;;  %v1746_v27 = vadd.f32 -1.0, %v635_v26  ;;  %v999_v26 = vsel %vm776_vm4, %v994_v25, 0  ;;  %s1788_s20 = sshll.u32 %s2121_s24, 6  ;;  %s2137_s24 = smov [#allocation5]  }
  0x22   : > { %v2312_v6 = vld [vmem:[%s541_s25] sm:$0xf]  ;;  %s2509_s2 = scalar_lea.hbm %s2573_s16, %s1788_s20 }
  0x23   : > { %1839 = vmatmul.mubr.msk.bf16.vlgmr.msra.gmra.mrb[0].mxu0 %vm574_vm1, %v550_v4  ;;  %v637_v29 = vmul.f32 1e+09, %v1746_v27 }
  0x24   : > { %1843 = vmatpush3.bf16.msra.mxu0 %v2013_v3  ;;  %1846 = vmatprep.mubr.msk.bf16.mxu0 %vm2132_vm0, %v2131_v1 }
  0x25   : > { %1844 = vmatprep.subr.bf16.mxu0 %v2131_v1  ;;  %v2341_v31 = vrot.slane %v637_v29, %v713_v30 }
  0x28   : > { %1845 = vmatpush3.bf16.msra.mxu0 %v2014_v5 }
  0x29   : > { %1850 = vmatprep.subr.bf16.mxu0 %v2131_v1 }
  0x2b   : > { %1847 = vmatmul.mubr.msk.bf16.vlgmr.msra.gmra.mrb[4].mxu0 %vm574_vm1, %v2312_v6 }
  0x2c   : > { %1852 = vmatprep.mubr.msk.bf16.mxu0 %vm2132_vm0, %v2131_v1 }
  0xf6   : > { %v612_v8 = vpop.f32.mrb[0].mxu0 }
  0xf7   : > { %v613_v9 = vadd.f32 %v1741_v7, %v612_v8  ;;  %v1840_v10 = vpop.f32.mrb[1].mxu0 }
  0xf8   : > { %v615_v11 = vpop.f32.mrb[2].mxu0 }
  0xf9   : > { %v618_v12 = vpack.c.bf16 %v613_v9, %v613_v9  ;;  %v1841_v13 = vpop.f32.mrb[3].mxu0 }
  0xfb   : > { %620 = vst.msk [vmem:[#allocation2] sm:$0xf] %vm619_vm2, %v618_v12 }
  0xfe   : > { %v699_v15 = vpop.f32.mrb[4].mxu0 }
  0xff   : > { %v700_v16 = vadd.f32 %v1747_v14, %v699_v15  ;;  %v1848_v17 = vpop.f32.mrb[5].mxu0 }
 0x100   : > { %v702_v18 = vpop.f32.mrb[6].mxu0 }
 0x101   : > { %v705_v19 = vmul.f32 0.35355338, %v700_v16  ;;  %v1849_v20 = vpop.f32.mrb[7].mxu0  ;;  %v822_v18 = vld [vmem:[#allocation4] sm:$0xff] }
 0x102   : > { %v708_v21 = vld [vmem:[#allocation2] sm:$0xf] }
 0x103   : > { %v2015_v22 = vld [vmem:[#allocation2] ss:$0 sps:$4 sm:$0xff]   ;;  %v721_v23 = vsel %vm716_vm3, %v708_v21, 0  ;;  %v2327_v24 = vpack.c.bf16 %v705_v19, %v705_v19 }
 0x104   : > { %1851 = vmatpush3.bf16.xpose.msra.mxu0 %v721_v23  ;;  %881 = vrot.lane.b32.xlu1 %v2015_v22, %s2133_s19  ;;  %v2017_v7 = vld [vmem:[#allocation2] ss:$0 sps:$4 sm:$0xff]  }
 0x105   : > { %1862 = vmatprep.subr.bf16.mxu0 %v2131_v1 }
 0x108   : > { %876 = vrot.lane.b32.xlu1 %v2327_v24, %s2133_s19 }
 0x10b   : > { %1853 = vmatmul.mubr.msk.bf16.vlgmr.msra.gmra.mrb[8].mxu0 %vm716_vm3, %v2327_v24 }
 0x10c   : > { %1864 = vmatprep.mubr.msk.bf16.mxu0 %vm2132_vm0, %v2131_v1  ;;  %1863 = vmatpush3.bf16.msra.mxu0 %v829_v52 }
 0x10d   : > { %1874 = vmatprep.subr.bf16.mxu0 %v2131_v1 }
 0x176   : > { %v882_v47 = vpop.permute.xlu1 %881 }
 0x177   : > { %v887_v48 = vsel %vm716_vm3, %v882_v47, 0 }
 0x17a   : > { %v877_v49 = vpop.permute.xlu1 %876 }
 0x1de   : > { %v757_v32 = vpop.f32.mrb[8].mxu0 }
 0x1df   : > { %v758_v33 = vadd.f32 %v757_v32, %v2341_v31  ;;  %v1854_v34 = vpop.f32.mrb[9].mxu0 }
 0x1e0   : > { %v760_v35 = vpop.f32.mrb[10].mxu0 }
 0x1e1   : > { %v1855_v36 = vpop.f32.mrb[11].mxu0  ;;  %v763_v37 = vsel %vm716_vm3, %v758_v33, -inf }
 0x1e2   : > { %764 = vmax.xlane.f32.xlu0 %v763_v37 }
 0x1f8   : > { %624 = vrot.lane.b32.xlu0 %v618_v12, %s2134_s17 }
 0x26f   : > { %v765_v38 = vpop.xlane.xlu0 %764 }
 0x270   : > { %v766_v39 = vsub.f32 %v758_v33, %v765_v38 }
 0x272   : > { %v767_v40 = vmul.f32 1.442695, %v766_v39 }
 0x273   : > { %v625_v41 = vpop.permute.xlu0 %624 }
 0x274   : > { %2031 = vpow2.f32 %v767_v40  ;;  %627 = vst.msk [vmem:[#allocation3] sm:$0xf] %vm619_vm2, %v625_v41 }
 0x27b   : > { %v709_v42 = vld [vmem:[#allocation3] sm:$0xf] }
 0x27c   : > { %v778_v43 = vsel %vm776_vm4, %v709_v42, 0  ;;  %v2016_v50 = vld [vmem:[#allocation3] ss:$0 sps:$4 sm:$0xff]  }
 0x27d   : > { %1857 = vmatpush3.bf16.msra.mxu1 %v778_v43  ;;  %v2018_v17 = vld [vmem:[#allocation3] ss:$0 sps:$4 sm:$0xff]   ;;  %v2019_v43 = vld [vmem:[#allocation2] ss:$0 sps:$4 sm:$0xff]  }
 0x27e   : > { %v2032_v44 = vpop.eup %2031  ;;  %1868 = vmatprep.subr.bf16.mxu1 %v2131_v1 }
 0x27f   : > { %v769_v45 = vsel %vm716_vm3, %v2032_v44, 0.0  ;;  %v772_v46 = vpack.c.bf16 %v2032_v44, %v2032_v44 }
 0x280   : > { %770 = vadd.xlane.f32.xlu1 %v769_v45 }
 0x281   : > { %1859 = vmatmul.mubr.msk.bf16.vlgmr.msra.gmra.mrb[0].mxu1 %vm716_vm3, %v772_v46 }
 0x282   : > { %1870 = vmatprep.mubr.msk.bf16.mxu1 %vm2132_vm0, %v2131_v1 }
 0x286   : > { %1869 = vmatpush3.bf16.xpose.msra.mxu1 %v887_v48 }
 0x287   : > { %1880 = vmatprep.subr.bf16.mxu1 %v2131_v1 }
 0x28d   : > { %1871 = vmatmul.mubr.msk.bf16.vlgmr.msra.gmra.mrb[4].mxu1 %vm716_vm3, %v877_v49 }
 0x28e   : > { %1882 = vmatprep.mubr.msk.bf16.mxu1 %vm2132_vm0, %v2131_v1  ;;  %1881 = vmatpush3.bf16.msra.mxu1 %v999_v26 }
 0x28f   : > { %1892 = vmatprep.subr.bf16.mxu1 %v2131_v1 }
 0x291   : > { %942 = vrot.lane.b32.xlu1 %v2016_v50, %s2133_s19 }
 0x295   : > { %1045 = vrot.lane.b32.xlu1 %v2327_v24, %s2135_s30 }
 0x30d   : > { %v771_v53 = vpop.xlane.xlu1 %770 }
 0x30e   : > { %2033 = vrcp.f32 %v771_v53  ;;  %v2020_v53 = vld [vmem:[#allocation3] ss:$0 sps:$4 sm:$0xff]  }
 0x311   : > { %v943_v58 = vpop.permute.xlu1 %942 }
 0x312   : > { %v948_v62 = vsel %vm776_vm4, %v943_v58, 0 }
 0x315   : > { %v1046_v16 = vpop.permute.xlu1 %1045 }
 0x318   : > { %v2034_v54 = vpop.eup %2033 }
 0x354   : > { %v814_v55 = vpop.f32.mrb[0].mxu1 }
 0x355   : > { %v821_v56 = vmul.f32 %v2034_v54, %v814_v55  ;;  %v1860_v57 = vpop.f32.mrb[1].mxu1 }
 0x356   : > { %v817_v59 = vpop.f32.mrb[2].mxu1 }
 0x357   : > { %v823_v60 = vpack.c.bf16 %v821_v56, %v821_v56  ;;  %v1861_v61 = vpop.f32.mrb[3].mxu1 }
 0x359   : > { %1865 = vmatmul.mubr.msk.bf16.vlgmr.msra.gmra.mrb[12].mxu0 %vm716_vm3, %v823_v60  ;;  %v1163_v60 = vld [vmem:[%s2563_s6 + $0x8] sm:$0xf] }
 0x35a   : > { %1875 = vmatpush3.bf16.msra.mxu0 %v948_v62  ;;  %1876 = vmatprep.mubr.msk.bf16.mxu0 %vm2132_vm0, %v2131_v1  ;;  %v1168_v61 = vsel %vm776_vm4, %v1163_v60, 0  ;;  %v2027_v60 = vld [vmem:[%s2569_s12 + $0x20] sm:$0xff]  }
 0x35b   : > { %1886 = vmatprep.subr.bf16.mxu0 %v2131_v1 }
 0x360   : > { %v923_v63 = vpop.f32.mrb[4].mxu1 }
 0x361   : > { %v924_v0 = vadd.f32 %v923_v63, %v2341_v31  ;;  %v1872_v2 = vpop.f32.mrb[5].mxu1 }
 0x362   : > { %v926_v3 = vpop.f32.mrb[6].mxu1 }
 0x363   : > { %v1873_v4 = vpop.f32.mrb[7].mxu1  ;;  %v929_v5 = vsel %vm716_vm3, %v924_v0, -inf }
 0x364   : > { %930 = vmax.xlane.f32.xlu0 %v929_v5 }
 0x37a   : > { %1050 = vrot.lane.b32.xlu0 %v2017_v7, %s2135_s30 }
 0x3f1   : > { %v931_v8 = vpop.xlane.xlu0 %930 }
 0x3f2   : > { %v932_v9 = vsub.f32 %v924_v0, %v931_v8 }
 0x3f4   : > { %v933_v10 = vmul.f32 1.442695, %v932_v9 }
 0x3f5   : > { %v1051_v12 = vpop.permute.xlu0 %1050 }
 0x3f6   : > { %2035 = vpow2.f32 %v933_v10  ;;  %v1056_v15 = vsel %vm716_vm3, %v1051_v12, 0 }
 0x400   : > { %v2036_v11 = vpop.eup %2035 }
 0x401   : > { %v935_v13 = vsel %vm716_vm3, %v2036_v11, 0.0  ;;  %v938_v14 = vpack.c.bf16 %v2036_v11, %v2036_v11 }
 0x402   : > { %936 = vadd.xlane.f32.xlu1 %v935_v13 }
 0x403   : > { %1877 = vmatmul.mubr.msk.bf16.vlgmr.msra.gmra.mrb[16].mxu0 %vm716_vm3, %v938_v14 }
 0x404   : > { %1887 = vmatpush3.bf16.xpose.msra.mxu0 %v1056_v15  ;;  %1888 = vmatprep.mubr.msk.bf16.mxu0 %vm2132_vm0, %v2131_v1 }
 0x405   : > { %1898 = vmatprep.subr.bf16.mxu0 %v2131_v1 }
 0x40b   : > { %1889 = vmatmul.mubr.msk.bf16.vlgmr.msra.gmra.mrb[20].mxu0 %vm716_vm3, %v1046_v16 }
 0x40c   : > { %1900 = vmatprep.mubr.msk.bf16.mxu0 %vm2132_vm0, %v2131_v1  ;;  %1899 = vmatpush3.bf16.msra.mxu0 %v1168_v61  ;;  %v2028_v61 = vld [vmem:[%s2569_s12 + $0x28] sm:$0xff]  }
 0x40d   : > { %1910 = vmatprep.subr.bf16.mxu0 %v2131_v1 }
 0x413   : > { %1111 = vrot.lane.b32.xlu1 %v2018_v17, %s2135_s30  ;;  %s535_s30 = sand.u32 1, %s2113_s22  }
 0x414   : > { %s1739_s4 = sshll.u32 %s535_s30, 2  ;;  %s1641_s29 = scalar_lea.sflag [#allocation6], %s535_s30 }
 0x415   : > { %s537_s27 = scalar_lea.vmem [#allocation5], %s1739_s4  ;;  %s2055_s4 = sshll.u32 %s2137_s24, 4  ;;  %s2056_s4 = int_to_ptr.vmem [resolvable:$false] %s2055_s4 }
 0x416   : > { %s1655_s28 = sshll.u32 %s537_s27, 4  ;;  %s2057_s25 = scalar_lea.vmem %s2056_s4, 128  ;;  %s2511_s28 = int_to_ptr.vmem [resolvable:$true] %s1655_s28 }
 0x417   : > { %1214 = vrot.lane.b32.xlu1 %v2327_v24, %s2136_s23  ;;  %p2058_p1 = scmp.lt.s32.totalorder %s2511_s28, %s2056_s4 }
 0x42c   : > { %v865_v19 = vpop.f32.mrb[12].mxu0 }
 0x42d   : > { %v871_v20 = vadd.f32 %v865_v19, %v822_v18  ;;  %v1866_v21 = vpop.f32.mrb[13].mxu0 }
 0x42e   : > { %v868_v22 = vpop.f32.mrb[14].mxu0 }
 0x42f   : > { %872 = vst.msk [vmem:[#allocation4] sm:$0xff] %vm574_vm1, %v871_v20  ;;  %v1867_v23 = vpop.f32.mrb[15].mxu0 }
 0x436   : > { %v992_v54 = vld [vmem:[#allocation4] sm:$0xff] }
 0x48f   : > { %v937_v27 = vpop.xlane.xlu1 %936 }
 0x490   : > { %2037 = vrcp.f32 %v937_v27 }
 0x493   : > { %v1112_v32 = vpop.permute.xlu1 %1111 }
 0x494   : > { %v1117_v36 = vsel %vm776_vm4, %v1112_v32, 0 }
 0x497   : > { %v1215_v52 = vpop.permute.xlu1 %1214 }
 0x49a   : > { %v2038_v24 = vpop.eup %2037 }
 0x4d6   : > { %v984_v28 = vpop.f32.mrb[16].mxu0 }
 0x4d7   : > { %v991_v29 = vmul.f32 %v2038_v24, %v984_v28  ;;  %v1878_v30 = vpop.f32.mrb[17].mxu0 }
 0x4d8   : > { %v987_v33 = vpop.f32.mrb[18].mxu0 }
 0x4d9   : > { %v993_v34 = vpack.c.bf16 %v991_v29, %v991_v29  ;;  %v1879_v35 = vpop.f32.mrb[19].mxu0 }
 0x4db   : > { %1883 = vmatmul.mubr.msk.bf16.vlgmr.msra.gmra.mrb[8].mxu1 %vm716_vm3, %v993_v34 }
 0x4dc   : > { %1893 = vmatpush3.bf16.msra.mxu1 %v1117_v36  ;;  %1894 = vmatprep.mubr.msk.bf16.mxu1 %vm2132_vm0, %v2131_v1 }
 0x4dd   : > { %1904 = vmatprep.subr.bf16.mxu1 %v2131_v1 }
 0x4de   : > { %v1092_v37 = vpop.f32.mrb[20].mxu0 }
 0x4df   : > { %v1093_v38 = vadd.f32 %v1092_v37, %v2341_v31  ;;  %v1890_v39 = vpop.f32.mrb[21].mxu0 }
 0x4e0   : > { %v1095_v40 = vpop.f32.mrb[22].mxu0 }
 0x4e1   : > { %v1891_v41 = vpop.f32.mrb[23].mxu0  ;;  %v1098_v42 = vsel %vm716_vm3, %v1093_v38, -inf }
 0x4e2   : > { %1099 = vmax.xlane.f32.xlu0 %v1098_v42 }
 0x4f8   : > { %1219 = vrot.lane.b32.xlu0 %v2019_v43, %s2136_s23 }
 0x56f   : > { %v1100_v44 = vpop.xlane.xlu0 %1099 }
 0x570   : > { %v1101_v45 = vsub.f32 %v1093_v38, %v1100_v44  ;;  %v1769_v44 = vld [vmem:[%s2564_s7] ss:$0 sm:$0xff] }
 0x572   : > { %v1102_v46 = vmul.f32 1.442695, %v1101_v45  ;;  %v634_v45 = vunpack.c.l.bf16 %v2312_v6  ;;  %v2021_v6 = vld [vmem:[%s2567_s10] sm:$0xff]  }
 0x573   : > { %v1220_v48 = vpop.permute.xlu0 %1219 }
 0x574   : > { %2039 = vpow2.f32 %v1102_v46  ;;  %v1225_v51 = vsel %vm716_vm3, %v1220_v48, 0 }
 0x57e   : > { %v2040_v47 = vpop.eup %2039 }
 0x57f   : > { %v1104_v49 = vsel %vm716_vm3, %v2040_v47, 0.0  ;;  %v1107_v50 = vpack.c.bf16 %v2040_v47, %v2040_v47 }
 0x580   : > { %1105 = vadd.xlane.f32.xlu1 %v1104_v49 }
 0x581   : > { %1895 = vmatmul.mubr.msk.bf16.vlgmr.msra.gmra.mrb[12].mxu1 %vm716_vm3, %v1107_v50 }
 0x582   : > { %1905 = vmatpush3.bf16.xpose.msra.mxu1 %v1225_v51  ;;  %1906 = vmatprep.mubr.msk.bf16.mxu1 %vm2132_vm0, %v2131_v1 }
 0x583   : > { %1916 = vmatprep.subr.bf16.mxu1 %v2131_v1 }
 0x589   : > { %1907 = vmatmul.mubr.msk.bf16.vlgmr.msra.gmra.mrb[16].mxu1 %vm716_vm3, %v1215_v52 }
 0x58a   : > { %1918 = vmatprep.mubr.msk.bf16.mxu1 %vm2132_vm0, %v2131_v1 }
 0x591   : > { %1280 = vrot.lane.b32.xlu1 %v2020_v53, %s2136_s23  ;;  %s2051_s23 = scalar_lea.vmem %s2511_s28, 64 }
 0x592   : > { %p2052_p12 = scmp.ne.s32.totalorder %s2511_s28, %s2051_s23  ;;  %p2059_p2 = scmp.lt.s32.totalorder %s2057_s25, %s2051_s23 }
 0x594   : > { %p2053_p13 = pnand %p2052_p12, %p2263_p4  ;;  %p2060_p3 = por %p2059_p2, %p2058_p1 }
 0x596   : > { %p2054_p0 = pneg %p2053_p13 }
 0x598   : > { %p2061_p5 = pnand %p2060_p3, %p2054_p0 }
 0x5ae   : > { %v1035_v55 = vpop.f32.mrb[8].mxu1 }
 0x5af   : > { %v1041_v56 = vadd.f32 %v1035_v55, %v992_v54  ;;  %v1884_v57 = vpop.f32.mrb[9].mxu1  ;;  %v2022_v55 = vld [vmem:[%s2567_s10 + $0x8] sm:$0xff]  }
 0x5b0   : > { %v1038_v58 = vpop.f32.mrb[10].mxu1  ;;  %v2024_v57 = vld [vmem:[%s2569_s12 + $0x8] sm:$0xff]  }
 0x5b1   : > { %1042 = vst.msk [vmem:[#allocation4] sm:$0xff] %vm574_vm1, %v1041_v56  ;;  %v1885_v59 = vpop.f32.mrb[11].mxu1  ;;  %v2023_v56 = vld [vmem:[%s2569_s12] sm:$0xff]   ;;  %v2025_v58 = vld [vmem:[%s2569_s12 + $0x10] sm:$0xff]  }
 0x5b2   : > { %v2026_v59 = vld [vmem:[%s2569_s12 + $0x18] sm:$0xff]  }
 0x5b8   : > { %v1161_v23 = vld [vmem:[#allocation4] sm:$0xff] }
 0x60d   : > { %v1106_v62 = vpop.xlane.xlu1 %1105 }
 0x60e   : > { %2041 = vrcp.f32 %v1106_v62 }
 0x611   : > { %v1281_v4 = vpop.permute.xlu1 %1280 }
 0x612   : > { %v1286_v9 = vsel %vm776_vm4, %v1281_v4, 0 }
 0x618   : > { %v2042_v63 = vpop.eup %2041 }
 0x654   : > { %v1153_v0 = vpop.f32.mrb[12].mxu1 }
 0x655   : > { %v1160_v2 = vmul.f32 %v2042_v63, %v1153_v0  ;;  %v1896_v3 = vpop.f32.mrb[13].mxu1 }
 0x656   : > { %v1156_v5 = vpop.f32.mrb[14].mxu1  ;;  %v1770_v3 = vld [vmem:[%s2565_s8] ss:$0 sm:$0xff] }
 0x657   : > { %v1162_v7 = vpack.c.bf16 %v1160_v2, %v1160_v2  ;;  %v1897_v8 = vpop.f32.mrb[15].mxu1  ;;  %v1771_v5 = vld [vmem:[%s2566_s9] ss:$0 sm:$0xff] }
 0x659   : > { %1901 = vmatmul.mubr.msk.bf16.vlgmr.msra.gmra.mrb[24].mxu0 %vm716_vm3, %v1162_v7 }
 0x65a   : > { %1911 = vmatpush3.bf16.msra.mxu0 %v1286_v9  ;;  %1912 = vmatprep.mubr.msk.bf16.mxu0 %vm2132_vm0, %v2131_v1 }
 0x65b   : > { %1922 = vmatprep.subr.bf16.mxu0 %v2131_v1 }
 0x65c   : > { %v1261_v10 = vpop.f32.mrb[16].mxu1 }
 0x65d   : > { %v1262_v11 = vadd.f32 %v1261_v10, %v2341_v31  ;;  %v1908_v12 = vpop.f32.mrb[17].mxu1  ;;  %v1332_v31 = vld [vmem:[%s2563_s6 + $0xc] sm:$0xf]  ;;  %v2029_v10 = vld [vmem:[%s2569_s12 + $0x30] sm:$0xff]  }
 0x65e   : > { %v1264_v13 = vpop.f32.mrb[18].mxu1  ;;  %v1337_v22 = vsel %vm776_vm4, %v1332_v31, 0  ;;  %v1772_v12 = vld [vmem:[%s2568_s11] ss:$0 sm:$0xff] }
 0x65f   : > { %v1909_v14 = vpop.f32.mrb[19].mxu1  ;;  %v1267_v15 = vsel %vm716_vm3, %v1262_v11, -inf  ;;  %1917 = vmatpush3.bf16.msra.mxu1 %v1337_v22 }
 0x660   : > { %1268 = vmax.xlane.f32.xlu0 %v1267_v15  ;;  %1930 = vmatprep.subr.bf16.mxu1 %v2131_v1 }
 0x6ed   : > { %v1269_v16 = vpop.xlane.xlu0 %1268 }
 0x6ee   : > { %v1270_v17 = vsub.f32 %v1262_v11, %v1269_v16  ;;  %v2030_v11 = vld [vmem:[%s2569_s12 + $0x38] sm:$0xff]  }
 0x6f0   : > { %v1271_v18 = vmul.f32 1.442695, %v1270_v17 }
 0x6f2   : > { %2043 = vpow2.f32 %v1271_v18 }
 0x6fc   : > { %v2044_v19 = vpop.eup %2043 }
 0x6fd   : > { %v1273_v20 = vsel %vm716_vm3, %v2044_v19, 0.0  ;;  %v1276_v21 = vpack.c.bf16 %v2044_v19, %v2044_v19 }
 0x6fe   : > { %1274 = vadd.xlane.f32.xlu0 %v1273_v20 }
 0x6ff   : > { %1913 = vmatmul.mubr.msk.bf16.vlgmr.msra.gmra.mrb[28].mxu0 %vm716_vm3, %v1276_v21 }
 0x700   : > { %1926 = vmatprep.mubr.msk.bf16.mxu0 %vm2132_vm0, %v2131_v1  ;;  %1923 = vmatpush3.bf16.msra.mxu0 %v2021_v6 }
 0x701   : > { %1924 = vmatprep.subr.bf16.mxu0 %v2131_v1 }
 0x704   : > { %1925 = vmatpush3.bf16.msra.mxu0 %v2022_v55 }
 0x72c   : > { %v1204_v25 = vpop.f32.mrb[24].mxu0 }
 0x72d   : > { %v1210_v26 = vadd.f32 %v1204_v25, %v1161_v23  ;;  %v1902_v27 = vpop.f32.mrb[25].mxu0  ;;  %v1784_v25 = vld [vmem:[%s2570_s13] ss:$0 sm:$0xff] }
 0x72e   : > { %v1207_v24 = vpop.f32.mrb[26].mxu0 }
 0x72f   : > { %1211 = vst.msk [vmem:[#allocation4] sm:$0xff] %vm574_vm1, %v1210_v26  ;;  %v1903_v28 = vpop.f32.mrb[27].mxu0 }
 0x736   : > { %v1330_v38 = vld [vmem:[#allocation4] sm:$0xff] }
 0x78b   : > { %v1275_v29 = vpop.xlane.xlu0 %1274 }
 0x78c   : > { %2045 = vrcp.f32 %v1275_v29 }
 0x796   : > { %v2046_v30 = vpop.eup %2045 }
 0x7d2   : > { %v1322_v32 = vpop.f32.mrb[28].mxu0 }
 0x7d3   : > { %v1329_v33 = vmul.f32 %v2046_v30, %v1322_v32  ;;  %v1914_v34 = vpop.f32.mrb[29].mxu0 }
 0x7d4   : > { %v1325_v35 = vpop.f32.mrb[30].mxu0 }
 0x7d5   : > { %v1331_v36 = vpack.c.bf16 %v1329_v33, %v1329_v33  ;;  %v1915_v37 = vpop.f32.mrb[31].mxu0 }
 0x7d7   : > { %1919 = vmatmul.mubr.msk.bf16.vlgmr.msra.gmra.mrb[20].mxu1 %vm716_vm3, %v1331_v36 }
 0x7d8   : > { %1946 = vmatprep.mubr.msk.bf16.mxu1 %vm2132_vm0, %v2131_v1  ;;  %1931 = vmatpush3.bf16.msra.mxu1 %v2023_v56 }
 0x7d9   : > { %1932 = vmatprep.subr.bf16.mxu1 %v2131_v1 }
 0x7dc   : > { %1933 = vmatpush3.bf16.msra.mxu1 %v2024_v57 }
 0x7dd   : > { %1934 = vmatprep.subr.bf16.mxu1 %v2131_v1 }
 0x7e0   : > { %1935 = vmatpush3.bf16.msra.mxu1 %v2025_v58 }
 0x7e1   : > { %1936 = vmatprep.subr.bf16.mxu1 %v2131_v1 }
 0x7e4   : > { %1937 = vmatpush3.bf16.msra.mxu1 %v2026_v59 }
 0x7e5   : > { %1938 = vmatprep.subr.bf16.mxu1 %v2131_v1 }
 0x7e8   : > { %1939 = vmatpush3.bf16.msra.mxu1 %v2027_v60 }
 0x7e9   : > { %1940 = vmatprep.subr.bf16.mxu1 %v2131_v1 }
 0x7ec   : > { %1941 = vmatpush3.bf16.msra.mxu1 %v2028_v61 }
 0x7ed   : > { %1942 = vmatprep.subr.bf16.mxu1 %v2131_v1 }
 0x7f0   : > { %1943 = vmatpush3.bf16.msra.mxu1 %v2029_v10 }
 0x7f1   : > { %1944 = vmatprep.subr.bf16.mxu1 %v2131_v1 }
 0x7f4   : > { %1945 = vmatpush3.bf16.msra.mxu1 %v2030_v11 }
 0x8aa   : > { %v1373_v39 = vpop.f32.mrb[20].mxu1 }
 0x8ab   : > { %v1379_v40 = vadd.f32 %v1373_v39, %v1330_v38  ;;  %v1920_v41 = vpop.f32.mrb[21].mxu1  ;;  %v1785_v39 = vld [vmem:[%s2571_s14] ss:$0 sm:$0xff] }
 0x8ac   : > { %v1376_v42 = vpop.f32.mrb[22].mxu1  ;;  %v1786_v41 = vld [vmem:[%s2572_s15] ss:$0 sm:$0xff] }
 0x8ad   : > { %1380 = vst.msk [vmem:[#allocation4] sm:$0xff] %vm574_vm1, %v1379_v40  ;;  %v1921_v43 = vpop.f32.mrb[23].mxu1 }
 0x8b4   : > { %v1381_v46 = vld [vmem:[#allocation4] sm:$0xff] }
 0x8b5   : > { %v1389_v47 = vadd.f32 %v1769_v44, %v1381_v46  ;;  %1422 = vst.msk [vmem:[#allocation4] sm:$0xff] %vm574_vm1, %v2131_v1 }
 0x8b7   : > { %v1390_v48 = vadd.f32 %v1389_v47, %v634_v45 }
 0x8b9   : > { %v1391_v49 = vsel %vm574_vm1, %v1390_v48, 0.0 }
 0x8ba   : > { %1392 = vadd.xlane.f32.xlu0 %v1391_v49 }
 0x8bc   : > { %v1491_v20 = vld [vmem:[#allocation4] sm:$0xff] }
 0x947   : > { %v1393_v50 = vpop.xlane.xlu0 %1392 }
 0x948   : > { %v1395_v51 = vmul.f32 0.03125, %v1393_v50 }
 0x94a   : > { %v1396_v52 = vsub.f32 %v1390_v48, %v1395_v51 }
 0x94c   : > { %v1397_v53 = vmul.f32 %v1396_v52, %v1396_v52 }
 0x94e   : > { %v1398_v54 = vsel %vm574_vm1, %v1397_v53, 0.0 }
 0x94f   : > { %1399 = vadd.xlane.f32.xlu0 %v1398_v54 }
 0x9dc   : > { %v1400_v62 = vpop.xlane.xlu0 %1399 }
 0x9dd   : > { %v1401_v63 = vmul.f32 0.03125, %v1400_v62 }
 0x9df   : > { %v1402_v0 = vadd.f32 1e-05, %v1401_v63 }
 0x9e1   : > { %2047 = vrsqrt.f32 %v1402_v0 }
 0x9eb   : > { %v2048_v2 = vpop.eup %2047 }
 0x9ec   : > { %v1404_v4 = vmul.f32 %v2048_v2, %v1396_v52 }
 0x9ee   : > { %v1412_v7 = vmul.f32 %v1770_v3, %v1404_v4 }
 0x9f0   : > { %v1420_v8 = vadd.f32 %v1771_v5, %v1412_v7 }
 0x9f2   : > { %v1421_v9 = vpack.c.bf16 %v1420_v8, %v1420_v8 }
 0x9f4   : > { %1927 = vmatmul.mubr.msk.bf16.vlgmr.msra.gmra.mrb[32].mxu0 %vm574_vm1, %v1421_v9 }
 0xac7   : > { %v1483_v13 = vpop.f32.mrb[32].mxu0 }
 0xac8   : > { %v1484_v14 = vadd.f32 %v1772_v12, %v1483_v13  ;;  %v1928_v15 = vpop.f32.mrb[33].mxu0 }
 0xac9   : > { %v1486_v16 = vpop.f32.mrb[34].mxu0 }
 0xaca   : > { %v1489_v17 = vmax.f32 %v1484_v14, 0.0  ;;  %v1929_v18 = vpop.f32.mrb[35].mxu0 }
 0xacc   : > { %v1490_v19 = vpack.c.bf16 %v1489_v17, %v1489_v17 }
 0xace   : > { %1947 = vmatmul.mubr.bf16.vlgmr.msra.gmra.mrb[24].mxu1 %v1490_v19 }
 0xba1   : > { %v1590_v21 = vpop.f32.mrb[24].mxu1 }
 0xba2   : > { %v1596_v1 = vadd.f32 %v1590_v21, %v1491_v20  ;;  %v1948_v31 = vpop.f32.mrb[25].mxu1 }
 0xba3   : > { %v1593_v22 = vpop.f32.mrb[26].mxu1 }
 0xba4   : > { %1597 = vst.msk [vmem:[#allocation4] sm:$0xff] %vm574_vm1, %v1596_v1  ;;  %v1949_v23 = vpop.f32.mrb[27].mxu1 }
 0xbab   : > { %v1598_v26 = vld [vmem:[#allocation4] sm:$0xff] }
 0xbac   : > { %v1606_v27 = vadd.f32 %v1784_v25, %v1598_v26 }
 0xbae   : > { %v1607_v24 = vadd.f32 %v1606_v27, %v1420_v8 }
 0xbb0   : > { %v1608_v28 = vsel %vm574_vm1, %v1607_v24, 0.0 }
 0xbb1   : > { %1609 = vadd.xlane.f32.xlu0 %v1608_v28 }
 0xc3e   : > { %v1610_v29 = vpop.xlane.xlu0 %1609 }
 0xc3f   : > { %v1611_v30 = vmul.f32 0.03125, %v1610_v29 }
 0xc41   : > { %v1612_v32 = vsub.f32 %v1607_v24, %v1611_v30 }
 0xc43   : > { %v1613_v33 = vmul.f32 %v1612_v32, %v1612_v32 }
 0xc45   : > { %v1614_v34 = vsel %vm574_vm1, %v1613_v33, 0.0 }
 0xc46   : > { %1615 = vadd.xlane.f32.xlu1 %v1614_v34 }
 0xcd3   : > { %v1616_v35 = vpop.xlane.xlu1 %1615 }
 0xcd4   : > { %v1617_v36 = vmul.f32 0.03125, %v1616_v35 }
 0xcd6   : > { %v1618_v37 = vadd.f32 1e-05, %v1617_v36 }
 0xcd8   : > { %2049 = vrsqrt.f32 %v1618_v37 }
 0xce2   : > { %v2050_v38 = vpop.eup %2049 }
 0xce3   : > { %v1620_v40 = vmul.f32 %v2050_v38, %v1612_v32 }
 0xce5   : > { %v1628_v42 = vmul.f32 %v1785_v39, %v1620_v40 }
 0xce7   : > { %v1636_v43 = vadd.f32 %v1786_v41, %v1628_v42 }
 0xce9   : > { %v1637_v44 = vpack.c.bf16 %v1636_v43, %v1636_v43 }
 0xceb   : > { %1639 = vst.msk [vmem:[%s537_s27] sm:$0xf] %vm619_vm2, %v1637_v44 }
 0xcec   : > { %2064 = shalt.err (!%p2061_p5)
}
 0xced   : > { %s2065_s1 = scalar_lea.hbm %s2509_s2, 64  ;;  %s2069_s20 = scalar_lea.hbm %s2573_s16, 128 }
 0xcee   : > { %p2066_p6 = scmp.ne.s32.totalorder %s2509_s2, %s2065_s1  ;;  %p2070_p10 = scmp.lt.u32.totalorder %s2509_s2, %s2573_s16 }
 0xcef   : > { %p2071_p11 = scmp.lt.u32.totalorder %s2069_s20, %s2065_s1  ;;  %p2073_p13 = scmp.lt.u32.totalorder %s2065_s1, %s2509_s2 }
 0xcf0   : > { %p2067_p7 = pnand %p2066_p6, %p2263_p4 }
 0xcf1   : > { %p2072_p12 = por %p2071_p11, %p2070_p10 }
 0xcf2   : > { %p2068_p9 = pneg %p2067_p7 }
 0xcf3   : > { %p2074_p0 = por %p2073_p13, %p2072_p12 }
 0xcf5   : > { %p2075_p1 = pnand %p2074_p0, %p2068_p9 }
 0xcf7   : > { %2078 = shalt.err (!%p2075_p1)
}
 0xcf8   : > { %1950 = dma.vmem_to_hbm [thread:$0]  (%p2263_p4), %s2511_s28, 64, %s2509_s2, %s1641_s29  }
 0xcf9 PF: > { %p1956_p2 = scmp.ge.s32.totalorder %s2129_s26, 2  ;;  %s1667_s23 = sand.u32 1, %s2109_s21  }
 0xcfa   : > { %s1668_s24 = scalar_lea.sflag [#allocation6], %s1667_s23 }
 0xcfb   : > { %p1953_p3 = pnand %p1956_p2, %p2270_p8 }
 0xcfd   : > { %2104 = dma.done.wait (!%p1953_p3), %s1668_s24, 64  }
 0xcfe   : > { %2106 = vsyncadd (!%p1953_p3), %s1668_s24, 4294967232  ;;  %s29_s26 = sadd.s32 1, %s2129_s26   ;;  %s2591_s4 = sld [smem:[#allocation8_spill]] }
 0xcff   : > { %p26_p5 = scmp.ge.s32.totalorder %s29_s26, 4   ;;  %s2592_s23 = sld [smem:[#allocation11_spill]] }
 0xd00   : > { %s2593_s24 = sld [smem:[#allocation9_spill]]  ;;  %s2594_s25 = sld [smem:[#allocation10_spill]] }
 0xd01   : > { %s2595_s21 = smov %s2113_s22  ;;  %28 = sbr.rel (!%p26_p5) target bundleno = 9 (0x9), region = 127 }
 0xd04   : > { %s2596_s22 = smov %s2591_s4 }
 0xd08   :  { %1673 = vsyncpa [#allocation6], 1 }
 0xd09   :  { %1675 = vsyncpa [#allocation6 + $0x1], 1 }

// kernel: tpu_custom_call.1
= control target key start
LH: loop header
LB: loop body
LE: loop exit
PB: predicated region body
PF: predicated region fallthrough
CT: control target
= control target key end

     0   :  { %s2557_s0 = inlined_call_operand.vmem [shape: bf16[2,8,32], index: 0, kind: input, shape index: {}]   ;;  %s2558_s1 = inlined_call_operand.vmem [shape: f32[2,1,8], index: 1, kind: input, shape index: {}]   ;;  %s2559_s2 = inlined_call_operand.vmem [shape: bf16[32,32], index: 2, kind: input, shape index: {}]   ;;  %s2560_s3 = inlined_call_operand.vmem [shape: f32[1,32], index: 3, kind: input, shape index: {}]   ;;  %s2561_s4 = inlined_call_operand.vmem [shape: bf16[32,64], index: 4, kind: input, shape index: {}]   ;;  %s2562_s5 = inlined_call_operand.vmem [shape: f32[1,64], index: 5, kind: input, shape index: {}]   ;;  %s2563_s6 = inlined_call_operand.vmem [shape: bf16[32,32], index: 6, kind: input, shape index: {}]   ;;  %s2564_s7 = inlined_call_operand.vmem [shape: f32[1,32], index: 7, kind: input, shape index: {}]   ;;  %s2565_s8 = inlined_call_operand.vmem [shape: f32[1,32], index: 8, kind: input, shape index: {}]   ;;  %s2566_s9 = inlined_call_operand.vmem [shape: f32[1,32], index: 9, kind: input, shape index: {}]   ;;  %s2567_s10 = inlined_call_operand.vmem [shape: bf16[32,128], index: 10, kind: input, shape index: {}]   ;;  %s2568_s11 = inlined_call_operand.vmem [shape: f32[1,128], index: 11, kind: input, shape index: {}]   ;;  %s2569_s12 = inlined_call_operand.vmem [shape: bf16[128,32], index: 12, kind: input, shape index: {}]   ;;  %s2570_s13 = inlined_call_operand.vmem [shape: f32[1,32], index: 13, kind: input, shape index: {}]   ;;  %s2571_s14 = inlined_call_operand.vmem [shape: f32[1,32], index: 14, kind: input, shape index: {}]   ;;  %s2572_s15 = inlined_call_operand.vmem [shape: f32[1,32], index: 15, kind: input, shape index: {}]   ;;  %s2573_s16 = inlined_call_operand.hbm [shape: bf16[2,8,32], index: 16, kind: output, shape index: {}]  }
   0x1   :  { %2577 = sst [smem:[#allocation12_spill]] %s2557_s0 }
   0x2   :  { %2578 = sst [smem:[#allocation13_spill]] %s2558_s1 }
   0x3   :  { %2579 = sst [smem:[#allocation14_spill]] %s2559_s2 }
   0x4   :  { %2580 = sst [smem:[#allocation15_spill]] %s2561_s4 }
   0x5   :  { %21 = vsyncpa [#allocation6], 0 }
   0x6   :  { %23 = vsyncpa [#allocation6 + $0x1], 0  ;;  %s2223_s21 = smov 0   ;;  %s2225_s22 = smov 0  }
   0x7   :  { %s2227_s23 = smov 0   ;;  %s2229_s24 = smov 0  }
   0x8   :  { %s2231_s25 = smov 0   ;;  %s2233_s26 = smov 0  }
   0x9 LB: > { %2581 = sst [smem:[#allocation8_spill]] %s2117_s23  ;;  %s1734_s27 = sadd.s32 4294967295, %s2129_s26   ;;  %s2129_s26 = sphi %s2233_s26, %s29_s26   ;;  %s2125_s25 = sphi %s2231_s25, %s2594_s25   ;;  %s2121_s24 = sphi %s2229_s24, %s2593_s24   ;;  %s2117_s23 = sphi %s2227_s23, %s2592_s23   ;;  %s2113_s22 = sphi %s2225_s22, %s2596_s22   ;;  %s2109_s21 = sphi %s2223_s21, %s2595_s21  }
   0xa   : > { %2582 = sst [smem:[#allocation9_spill]] %s2125_s25  ;;  %s1735_s28 = sadd.s32 4294967294, %s2129_s26  }
   0xb   : > { %s41_s29 = sadd.s32 1, %s2125_s25  ;;  %s396_s30 = sadd.s32 1, %s2117_s23 }
   0xc   : > { %p43_p0 = scmp.ge.s32.totalorder %s41_s29, 2  ;;  %p406_p1 = scmp.ne.s32.totalorder %s2117_s23, %s2113_s22 }
   0xd   : > { %p407_p2 = scmp.eq.s32.totalorder %s1734_s27, 1  ;;  %p412_p3 = scmp.ne.s32.totalorder %s2113_s22, %s2109_s21 }
   0xe   : > { %s2598_s29 = smov (%p43_p0, %s41_s29), 0  ;;  %p413_p5 = scmp.eq.s32.totalorder %s1735_s28, 1 }
   0xf   : > { %2583 = sst [smem:[#allocation10_spill]] %s2598_s29  ;;  %p2263_p4 = por %p407_p2, %p406_p1 }
  0x10   : > { %s391_s17 = ssub.s32 %s2125_s25, %s2598_s29  ;;  %p1738_p6 = scmp.ge.s32.totalorder %s2129_s26, 1 }
  0x11   : > { %p394_p7 = scmp.eq.s32.totalorder %s391_s17, 0  ;;  %p2270_p8 = por %p413_p5, %p412_p3 }
  0x12   : > { %p486_p9 = scmp.lt.s32.totalorder %s2129_s26, 3 }
  0x13   : > { %s2276_s19 = scalar_select %p394_p7, %s2117_s23, %s396_s30  }
  0x14   : > { %p487_p10 = pnand %p1738_p6, %p486_p9 }
  0x15   : > { %2586 = sst [smem:[#allocation11_spill]] %s2276_s19  ;;  %s2587_s4 = sld [smem:[#allocation15_spill]] (!%p487_p10)  ;;  %v2131_v1 = vmov (!%p487_p10), 0.0   ;;  %vm2132_vm0 = vmmov (!%p487_p10), 0   ;;  %vm574_vm1 = vcmask (!%p487_p10), 261120   ;;  %vm619_vm2 = vcmask (!%p487_p10), 257024  }
  0x16   : > { %490 = sbr.rel (%p487_p10) target bundleno = 3321 (0xcf9), region = 84  ;;  %1834 = vmatprep.subr.bf16.mxu0 (!%p487_p10), %v2131_v1  ;;  %1856 = vmatprep.subr.bf16.mxu1 (!%p487_p10), %v2131_v1  ;;  %p538_p11 = scmp.lt.s32.totalorder (!%p487_p10), %s2121_s24, 1  ;;  %707 = vst.msk [vmem:[#allocation4] sm:$0xff] (!%p487_p10), %vm574_vm1, %v2131_v1  ;;  %v1741_v7 = vld [vmem:[%s2562_s5] ss:$0 sm:$0xff] (!%p487_p10)  ;;  %vm716_vm3 = vcmask (!%p487_p10), 64512   ;;  %v711_v25 = vlaneseq (!%p487_p10) }
  0x17   : > { %1838 = vmatprep.mubr.msk.bf16.mxu0 (!%p487_p10), %vm2132_vm0, %v2131_v1  ;;  %1858 = vmatprep.mubr.msk.bf16.mxu1 (!%p487_p10), %vm2132_vm0, %v2131_v1  ;;  %s2588_s2 = sld [smem:[#allocation14_spill]] (!%p487_p10)  ;;  %s2589_s29 = sld [smem:[#allocation12_spill]] (!%p487_p10)  ;;  %v1747_v14 = vld [vmem:[%s2560_s3] ss:$0 sm:$0xff] (!%p487_p10)  ;;  %vm776_vm4 = vcmask (!%p487_p10), 1043456  }
  0x18   : > { %s2133_s19 = smov (!%p487_p10), 120   ;;  %s2590_s1 = sld [smem:[#allocation13_spill]] (!%p487_p10)  ;;  %v712_v28 = vshrl.u32 (!%p487_p10), %v711_v25, 7  ;;  %v824_v51 = vld [vmem:[%s2563_s6] sm:$0xf] (!%p487_p10) }
  0x19   : > { %s2134_s17 = smov (!%p487_p10), 96   ;;  %v829_v52 = vsel (!%p487_p10), %vm776_vm4, %v824_v51, 0  ;;  %s2136_s23 = smov (!%p487_p10), 104   ;;  %v994_v25 = vld [vmem:[%s2563_s6 + $0x4] sm:$0xf] (!%p487_p10) }
  0x1a   : > { %v713_v30 = vsub.s32 (!%p487_p10), 0, %v712_v28 }
  0x1b   : > { %v2011_v0 = vld [vmem:[%s2587_s4] sm:$0xff] (!%p487_p10)   ;;  %v2012_v2 = vld [vmem:[%s2587_s4 + $0x8] sm:$0xff] (!%p487_p10)  }
  0x1c   : > { %1835 = vmatpush3.bf16.msra.mxu0 (!%p487_p10), %v2011_v0 }
  0x1d   : > { %1836 = vmatprep.subr.bf16.mxu0 %v2131_v1  ;;  %s2295_s30 = scalar_select %p538_p11, %s2121_s24, 1  ;;  %v2013_v3 = vld [vmem:[%s2588_s2] sm:$0xff]   ;;  %v2014_v5 = vld [vmem:[%s2588_s2 + $0x8] sm:$0xff]  }
  0x1f   : > { %s1740_s20 = sshll.u32 %s2295_s30, 2  ;;  %s544_s28 = scalar_lea.vmem %s2590_s1, %s2295_s30 }
  0x20   : > { %1837 = vmatpush3.bf16.msra.mxu0 %v2012_v2  ;;  %s541_s25 = scalar_lea.vmem %s2589_s29, %s1740_s20  ;;  %v635_v26 = vld [vmem:[%s544_s28] sm:$0x1]  ;;  %s2135_s30 = smov 112  }
  0x21   : > { %1842 = vmatprep.subr.bf16.mxu0 %v2131_v1  ;;  %v550_v4 = vld [vmem:[%s541_s25] sm:$0xf]  ;;  %v1746_v27 = vadd.f32 -1.0, %v635_v26  ;;  %v999_v26 = vsel %vm776_vm4, %v994_v25, 0  ;;  %s1788_s20 = sshll.u32 %s2121_s24, 6  ;;  %s2137_s24 = smov [#allocation5]  }
  0x22   : > { %v2312_v6 = vld [vmem:[%s541_s25] sm:$0xf]  ;;  %s2509_s2 = scalar_lea.hbm %s2573_s16, %s1788_s20 }
  0x23   : > { %1839 = vmatmul.mubr.msk.bf16.vlgmr.msra.gmra.mrb[0].mxu0 %vm574_vm1, %v550_v4  ;;  %v637_v29 = vmul.f32 1e+09, %v1746_v27 }
  0x24   : > { %1843 = vmatpush3.bf16.msra.mxu0 %v2013_v3  ;;  %1846 = vmatprep.mubr.msk.bf16.mxu0 %vm2132_vm0, %v2131_v1 }
  0x25   : > { %1844 = vmatprep.subr.bf16.mxu0 %v2131_v1  ;;  %v2341_v31 = vrot.slane %v637_v29, %v713_v30 }
  0x28   : > { %1845 = vmatpush3.bf16.msra.mxu0 %v2014_v5 }
  0x29   : > { %1850 = vmatprep.subr.bf16.mxu0 %v2131_v1 }
  0x2b   : > { %1847 = vmatmul.mubr.msk.bf16.vlgmr.msra.gmra.mrb[4].mxu0 %vm574_vm1, %v2312_v6 }
  0x2c   : > { %1852 = vmatprep.mubr.msk.bf16.mxu0 %vm2132_vm0, %v2131_v1 }
  0xf6   : > { %v612_v8 = vpop.f32.mrb[0].mxu0 }
  0xf7   : > { %v613_v9 = vadd.f32 %v1741_v7, %v612_v8  ;;  %v1840_v10 = vpop.f32.mrb[1].mxu0 }
  0xf8   : > { %v615_v11 = vpop.f32.mrb[2].mxu0 }
  0xf9   : > { %v618_v12 = vpack.c.bf16 %v613_v9, %v613_v9  ;;  %v1841_v13 = vpop.f32.mrb[3].mxu0 }
  0xfb   : > { %620 = vst.msk [vmem:[#allocation2] sm:$0xf] %vm619_vm2, %v618_v12 }
  0xfe   : > { %v699_v15 = vpop.f32.mrb[4].mxu0 }
  0xff   : > { %v700_v16 = vadd.f32 %v1747_v14, %v699_v15  ;;  %v1848_v17 = vpop.f32.mrb[5].mxu0 }
 0x100   : > { %v702_v18 = vpop.f32.mrb[6].mxu0 }
 0x101   : > { %v705_v19 = vmul.f32 0.35355338, %v700_v16  ;;  %v1849_v20 = vpop.f32.mrb[7].mxu0  ;;  %v822_v18 = vld [vmem:[#allocation4] sm:$0xff] }
 0x102   : > { %v708_v21 = vld [vmem:[#allocation2] sm:$0xf] }
 0x103   : > { %v2015_v22 = vld [vmem:[#allocation2] ss:$0 sps:$4 sm:$0xff]   ;;  %v721_v23 = vsel %vm716_vm3, %v708_v21, 0  ;;  %v2327_v24 = vpack.c.bf16 %v705_v19, %v705_v19 }
 0x104   : > { %1851 = vmatpush3.bf16.xpose.msra.mxu0 %v721_v23  ;;  %881 = vrot.lane.b32.xlu1 %v2015_v22, %s2133_s19  ;;  %v2017_v7 = vld [vmem:[#allocation2] ss:$0 sps:$4 sm:$0xff]  }
 0x105   : > { %1862 = vmatprep.subr.bf16.mxu0 %v2131_v1 }
 0x108   : > { %876 = vrot.lane.b32.xlu1 %v2327_v24, %s2133_s19 }
 0x10b   : > { %1853 = vmatmul.mubr.msk.bf16.vlgmr.msra.gmra.mrb[8].mxu0 %vm716_vm3, %v2327_v24 }
 0x10c   : > { %1864 = vmatprep.mubr.msk.bf16.mxu0 %vm2132_vm0, %v2131_v1  ;;  %1863 = vmatpush3.bf16.msra.mxu0 %v829_v52 }
 0x10d   : > { %1874 = vmatprep.subr.bf16.mxu0 %v2131_v1 }
 0x176   : > { %v882_v47 = vpop.permute.xlu1 %881 }
 0x177   : > { %v887_v48 = vsel %vm716_vm3, %v882_v47, 0 }
 0x17a   : > { %v877_v49 = vpop.permute.xlu1 %876 }
 0x1de   : > { %v757_v32 = vpop.f32.mrb[8].mxu0 }
 0x1df   : > { %v758_v33 = vadd.f32 %v757_v32, %v2341_v31  ;;  %v1854_v34 = vpop.f32.mrb[9].mxu0 }
 0x1e0   : > { %v760_v35 = vpop.f32.mrb[10].mxu0 }
 0x1e1   : > { %v1855_v36 = vpop.f32.mrb[11].mxu0  ;;  %v763_v37 = vsel %vm716_vm3, %v758_v33, -inf }
 0x1e2   : > { %764 = vmax.xlane.f32.xlu0 %v763_v37 }
 0x1f8   : > { %624 = vrot.lane.b32.xlu0 %v618_v12, %s2134_s17 }
 0x26f   : > { %v765_v38 = vpop.xlane.xlu0 %764 }
 0x270   : > { %v766_v39 = vsub.f32 %v758_v33, %v765_v38 }
 0x272   : > { %v767_v40 = vmul.f32 1.442695, %v766_v39 }
 0x273   : > { %v625_v41 = vpop.permute.xlu0 %624 }
 0x274   : > { %2031 = vpow2.f32 %v767_v40  ;;  %627 = vst.msk [vmem:[#allocation3] sm:$0xf] %vm619_vm2, %v625_v41 }
 0x27b   : > { %v709_v42 = vld [vmem:[#allocation3] sm:$0xf] }
 0x27c   : > { %v778_v43 = vsel %vm776_vm4, %v709_v42, 0  ;;  %v2016_v50 = vld [vmem:[#allocation3] ss:$0 sps:$4 sm:$0xff]  }
 0x27d   : > { %1857 = vmatpush3.bf16.msra.mxu1 %v778_v43  ;;  %v2018_v17 = vld [vmem:[#allocation3] ss:$0 sps:$4 sm:$0xff]   ;;  %v2019_v43 = vld [vmem:[#allocation2] ss:$0 sps:$4 sm:$0xff]  }
 0x27e   : > { %v2032_v44 = vpop.eup %2031  ;;  %1868 = vmatprep.subr.bf16.mxu1 %v2131_v1 }
 0x27f   : > { %v769_v45 = vsel %vm716_vm3, %v2032_v44, 0.0  ;;  %v772_v46 = vpack.c.bf16 %v2032_v44, %v2032_v44 }
 0x280   : > { %770 = vadd.xlane.f32.xlu1 %v769_v45 }
 0x281   : > { %1859 = vmatmul.mubr.msk.bf16.vlgmr.msra.gmra.mrb[0].mxu1 %vm716_vm3, %v772_v46 }
 0x282   : > { %1870 = vmatprep.mubr.msk.bf16.mxu1 %vm2132_vm0, %v2131_v1 }
 0x286   : > { %1869 = vmatpush3.bf16.xpose.msra.mxu1 %v887_v48 }
 0x287   : > { %1880 = vmatprep.subr.bf16.mxu1 %v2131_v1 }
 0x28d   : > { %1871 = vmatmul.mubr.msk.bf16.vlgmr.msra.gmra.mrb[4].mxu1 %vm716_vm3, %v877_v49 }
 0x28e   : > { %1882 = vmatprep.mubr.msk.bf16.mxu1 %vm2132_vm0, %v2131_v1  ;;  %1881 = vmatpush3.bf16.msra.mxu1 %v999_v26 }
 0x28f   : > { %1892 = vmatprep.subr.bf16.mxu1 %v2131_v1 }
 0x291   : > { %942 = vrot.lane.b32.xlu1 %v2016_v50, %s2133_s19 }
 0x295   : > { %1045 = vrot.lane.b32.xlu1 %v2327_v24, %s2135_s30 }
 0x30d   : > { %v771_v53 = vpop.xlane.xlu1 %770 }
 0x30e   : > { %2033 = vrcp.f32 %v771_v53  ;;  %v2020_v53 = vld [vmem:[#allocation3] ss:$0 sps:$4 sm:$0xff]  }
 0x311   : > { %v943_v58 = vpop.permute.xlu1 %942 }
 0x312   : > { %v948_v62 = vsel %vm776_vm4, %v943_v58, 0 }
 0x315   : > { %v1046_v16 = vpop.permute.xlu1 %1045 }
 0x318   : > { %v2034_v54 = vpop.eup %2033 }
 0x354   : > { %v814_v55 = vpop.f32.mrb[0].mxu1 }
 0x355   : > { %v821_v56 = vmul.f32 %v2034_v54, %v814_v55  ;;  %v1860_v57 = vpop.f32.mrb[1].mxu1 }
 0x356   : > { %v817_v59 = vpop.f32.mrb[2].mxu1 }
 0x357   : > { %v823_v60 = vpack.c.bf16 %v821_v56, %v821_v56  ;;  %v1861_v61 = vpop.f32.mrb[3].mxu1 }
 0x359   : > { %1865 = vmatmul.mubr.msk.bf16.vlgmr.msra.gmra.mrb[12].mxu0 %vm716_vm3, %v823_v60  ;;  %v1163_v60 = vld [vmem:[%s2563_s6 + $0x8] sm:$0xf] }
 0x35a   : > { %1875 = vmatpush3.bf16.msra.mxu0 %v948_v62  ;;  %1876 = vmatprep.mubr.msk.bf16.mxu0 %vm2132_vm0, %v2131_v1  ;;  %v1168_v61 = vsel %vm776_vm4, %v1163_v60, 0  ;;  %v2027_v60 = vld [vmem:[%s2569_s12 + $0x20] sm:$0xff]  }
 0x35b   : > { %1886 = vmatprep.subr.bf16.mxu0 %v2131_v1 }
 0x360   : > { %v923_v63 = vpop.f32.mrb[4].mxu1 }
 0x361   : > { %v924_v0 = vadd.f32 %v923_v63, %v2341_v31  ;;  %v1872_v2 = vpop.f32.mrb[5].mxu1 }
 0x362   : > { %v926_v3 = vpop.f32.mrb[6].mxu1 }
 0x363   : > { %v1873_v4 = vpop.f32.mrb[7].mxu1  ;;  %v929_v5 = vsel %vm716_vm3, %v924_v0, -inf }
 0x364   : > { %930 = vmax.xlane.f32.xlu0 %v929_v5 }
 0x37a   : > { %1050 = vrot.lane.b32.xlu0 %v2017_v7, %s2135_s30 }
 0x3f1   : > { %v931_v8 = vpop.xlane.xlu0 %930 }
 0x3f2   : > { %v932_v9 = vsub.f32 %v924_v0, %v931_v8 }
 0x3f4   : > { %v933_v10 = vmul.f32 1.442695, %v932_v9 }
 0x3f5   : > { %v1051_v12 = vpop.permute.xlu0 %1050 }
 0x3f6   : > { %2035 = vpow2.f32 %v933_v10  ;;  %v1056_v15 = vsel %vm716_vm3, %v1051_v12, 0 }
 0x400   : > { %v2036_v11 = vpop.eup %2035 }
 0x401   : > { %v935_v13 = vsel %vm716_vm3, %v2036_v11, 0.0  ;;  %v938_v14 = vpack.c.bf16 %v2036_v11, %v2036_v11 }
 0x402   : > { %936 = vadd.xlane.f32.xlu1 %v935_v13 }
 0x403   : > { %1877 = vmatmul.mubr.msk.bf16.vlgmr.msra.gmra.mrb[16].mxu0 %vm716_vm3, %v938_v14 }
 0x404   : > { %1887 = vmatpush3.bf16.xpose.msra.mxu0 %v1056_v15  ;;  %1888 = vmatprep.mubr.msk.bf16.mxu0 %vm2132_vm0, %v2131_v1 }
 0x405   : > { %1898 = vmatprep.subr.bf16.mxu0 %v2131_v1 }
 0x40b   : > { %1889 = vmatmul.mubr.msk.bf16.vlgmr.msra.gmra.mrb[20].mxu0 %vm716_vm3, %v1046_v16 }
 0x40c   : > { %1900 = vmatprep.mubr.msk.bf16.mxu0 %vm2132_vm0, %v2131_v1  ;;  %1899 = vmatpush3.bf16.msra.mxu0 %v1168_v61  ;;  %v2028_v61 = vld [vmem:[%s2569_s12 + $0x28] sm:$0xff]  }
 0x40d   : > { %1910 = vmatprep.subr.bf16.mxu0 %v2131_v1 }
 0x413   : > { %1111 = vrot.lane.b32.xlu1 %v2018_v17, %s2135_s30  ;;  %s535_s30 = sand.u32 1, %s2113_s22  }
 0x414   : > { %s1739_s4 = sshll.u32 %s535_s30, 2  ;;  %s1641_s29 = scalar_lea.sflag [#allocation6], %s535_s30 }
 0x415   : > { %s537_s27 = scalar_lea.vmem [#allocation5], %s1739_s4  ;;  %s2055_s4 = sshll.u32 %s2137_s24, 4  ;;  %s2056_s4 = int_to_ptr.vmem [resolvable:$false] %s2055_s4 }
 0x416   : > { %s1655_s28 = sshll.u32 %s537_s27, 4  ;;  %s2057_s25 = scalar_lea.vmem %s2056_s4, 128  ;;  %s2511_s28 = int_to_ptr.vmem [resolvable:$true] %s1655_s28 }
 0x417   : > { %1214 = vrot.lane.b32.xlu1 %v2327_v24, %s2136_s23  ;;  %p2058_p1 = scmp.lt.s32.totalorder %s2511_s28, %s2056_s4 }
 0x42c   : > { %v865_v19 = vpop.f32.mrb[12].mxu0 }
 0x42d   : > { %v871_v20 = vadd.f32 %v865_v19, %v822_v18  ;;  %v1866_v21 = vpop.f32.mrb[13].mxu0 }
 0x42e   : > { %v868_v22 = vpop.f32.mrb[14].mxu0 }
 0x42f   : > { %872 = vst.msk [vmem:[#allocation4] sm:$0xff] %vm574_vm1, %v871_v20  ;;  %v1867_v23 = vpop.f32.mrb[15].mxu0 }
 0x436   : > { %v992_v54 = vld [vmem:[#allocation4] sm:$0xff] }
 0x48f   : > { %v937_v27 = vpop.xlane.xlu1 %936 }
 0x490   : > { %2037 = vrcp.f32 %v937_v27 }
 0x493   : > { %v1112_v32 = vpop.permute.xlu1 %1111 }
 0x494   : > { %v1117_v36 = vsel %vm776_vm4, %v1112_v32, 0 }
 0x497   : > { %v1215_v52 = vpop.permute.xlu1 %1214 }
 0x49a   : > { %v2038_v24 = vpop.eup %2037 }
 0x4d6   : > { %v984_v28 = vpop.f32.mrb[16].mxu0 }
 0x4d7   : > { %v991_v29 = vmul.f32 %v2038_v24, %v984_v28  ;;  %v1878_v30 = vpop.f32.mrb[17].mxu0 }
 0x4d8   : > { %v987_v33 = vpop.f32.mrb[18].mxu0 }
 0x4d9   : > { %v993_v34 = vpack.c.bf16 %v991_v29, %v991_v29  ;;  %v1879_v35 = vpop.f32.mrb[19].mxu0 }
 0x4db   : > { %1883 = vmatmul.mubr.msk.bf16.vlgmr.msra.gmra.mrb[8].mxu1 %vm716_vm3, %v993_v34 }
 0x4dc   : > { %1893 = vmatpush3.bf16.msra.mxu1 %v1117_v36  ;;  %1894 = vmatprep.mubr.msk.bf16.mxu1 %vm2132_vm0, %v2131_v1 }
 0x4dd   : > { %1904 = vmatprep.subr.bf16.mxu1 %v2131_v1 }
 0x4de   : > { %v1092_v37 = vpop.f32.mrb[20].mxu0 }
 0x4df   : > { %v1093_v38 = vadd.f32 %v1092_v37, %v2341_v31  ;;  %v1890_v39 = vpop.f32.mrb[21].mxu0 }
 0x4e0   : > { %v1095_v40 = vpop.f32.mrb[22].mxu0 }
 0x4e1   : > { %v1891_v41 = vpop.f32.mrb[23].mxu0  ;;  %v1098_v42 = vsel %vm716_vm3, %v1093_v38, -inf }
 0x4e2   : > { %1099 = vmax.xlane.f32.xlu0 %v1098_v42 }
 0x4f8   : > { %1219 = vrot.lane.b32.xlu0 %v2019_v43, %s2136_s23 }
 0x56f   : > { %v1100_v44 = vpop.xlane.xlu0 %1099 }
 0x570   : > { %v1101_v45 = vsub.f32 %v1093_v38, %v1100_v44  ;;  %v1769_v44 = vld [vmem:[%s2564_s7] ss:$0 sm:$0xff] }
 0x572   : > { %v1102_v46 = vmul.f32 1.442695, %v1101_v45  ;;  %v634_v45 = vunpack.c.l.bf16 %v2312_v6  ;;  %v2021_v6 = vld [vmem:[%s2567_s10] sm:$0xff]  }
 0x573   : > { %v1220_v48 = vpop.permute.xlu0 %1219 }
 0x574   : > { %2039 = vpow2.f32 %v1102_v46  ;;  %v1225_v51 = vsel %vm716_vm3, %v1220_v48, 0 }
 0x57e   : > { %v2040_v47 = vpop.eup %2039 }
 0x57f   : > { %v1104_v49 = vsel %vm716_vm3, %v2040_v47, 0.0  ;;  %v1107_v50 = vpack.c.bf16 %v2040_v47, %v2040_v47 }
 0x580   : > { %1105 = vadd.xlane.f32.xlu1 %v1104_v49 }
 0x581   : > { %1895 = vmatmul.mubr.msk.bf16.vlgmr.msra.gmra.mrb[12].mxu1 %vm716_vm3, %v1107_v50 }
 0x582   : > { %1905 = vmatpush3.bf16.xpose.msra.mxu1 %v1225_v51  ;;  %1906 = vmatprep.mubr.msk.bf16.mxu1 %vm2132_vm0, %v2131_v1 }
 0x583   : > { %1916 = vmatprep.subr.bf16.mxu1 %v2131_v1 }
 0x589   : > { %1907 = vmatmul.mubr.msk.bf16.vlgmr.msra.gmra.mrb[16].mxu1 %vm716_vm3, %v1215_v52 }
 0x58a   : > { %1918 = vmatprep.mubr.msk.bf16.mxu1 %vm2132_vm0, %v2131_v1 }
 0x591   : > { %1280 = vrot.lane.b32.xlu1 %v2020_v53, %s2136_s23  ;;  %s2051_s23 = scalar_lea.vmem %s2511_s28, 64 }
 0x592   : > { %p2052_p12 = scmp.ne.s32.totalorder %s2511_s28, %s2051_s23  ;;  %p2059_p2 = scmp.lt.s32.totalorder %s2057_s25, %s2051_s23 }
 0x594   : > { %p2053_p13 = pnand %p2052_p12, %p2263_p4  ;;  %p2060_p3 = por %p2059_p2, %p2058_p1 }
 0x596   : > { %p2054_p0 = pneg %p2053_p13 }
 0x598   : > { %p2061_p5 = pnand %p2060_p3, %p2054_p0 }
 0x5ae   : > { %v1035_v55 = vpop.f32.mrb[8].mxu1 }
 0x5af   : > { %v1041_v56 = vadd.f32 %v1035_v55, %v992_v54  ;;  %v1884_v57 = vpop.f32.mrb[9].mxu1  ;;  %v2022_v55 = vld [vmem:[%s2567_s10 + $0x8] sm:$0xff]  }
 0x5b0   : > { %v1038_v58 = vpop.f32.mrb[10].mxu1  ;;  %v2024_v57 = vld [vmem:[%s2569_s12 + $0x8] sm:$0xff]  }
 0x5b1   : > { %1042 = vst.msk [vmem:[#allocation4] sm:$0xff] %vm574_vm1, %v1041_v56  ;;  %v1885_v59 = vpop.f32.mrb[11].mxu1  ;;  %v2023_v56 = vld [vmem:[%s2569_s12] sm:$0xff]   ;;  %v2025_v58 = vld [vmem:[%s2569_s12 + $0x10] sm:$0xff]  }
 0x5b2   : > { %v2026_v59 = vld [vmem:[%s2569_s12 + $0x18] sm:$0xff]  }
 0x5b8   : > { %v1161_v23 = vld [vmem:[#allocation4] sm:$0xff] }
 0x60d   : > { %v1106_v62 = vpop.xlane.xlu1 %1105 }
 0x60e   : > { %2041 = vrcp.f32 %v1106_v62 }
 0x611   : > { %v1281_v4 = vpop.permute.xlu1 %1280 }
 0x612   : > { %v1286_v9 = vsel %vm776_vm4, %v1281_v4, 0 }
 0x618   : > { %v2042_v63 = vpop.eup %2041 }
 0x654   : > { %v1153_v0 = vpop.f32.mrb[12].mxu1 }
 0x655   : > { %v1160_v2 = vmul.f32 %v2042_v63, %v1153_v0  ;;  %v1896_v3 = vpop.f32.mrb[13].mxu1 }
 0x656   : > { %v1156_v5 = vpop.f32.mrb[14].mxu1  ;;  %v1770_v3 = vld [vmem:[%s2565_s8] ss:$0 sm:$0xff] }
 0x657   : > { %v1162_v7 = vpack.c.bf16 %v1160_v2, %v1160_v2  ;;  %v1897_v8 = vpop.f32.mrb[15].mxu1  ;;  %v1771_v5 = vld [vmem:[%s2566_s9] ss:$0 sm:$0xff] }
 0x659   : > { %1901 = vmatmul.mubr.msk.bf16.vlgmr.msra.gmra.mrb[24].mxu0 %vm716_vm3, %v1162_v7 }
 0x65a   : > { %1911 = vmatpush3.bf16.msra.mxu0 %v1286_v9  ;;  %1912 = vmatprep.mubr.msk.bf16.mxu0 %vm2132_vm0, %v2131_v1 }
 0x65b   : > { %1922 = vmatprep.subr.bf16.mxu0 %v2131_v1 }
 0x65c   : > { %v1261_v10 = vpop.f32.mrb[16].mxu1 }
 0x65d   : > { %v1262_v11 = vadd.f32 %v1261_v10, %v2341_v31  ;;  %v1908_v12 = vpop.f32.mrb[17].mxu1  ;;  %v1332_v31 = vld [vmem:[%s2563_s6 + $0xc] sm:$0xf]  ;;  %v2029_v10 = vld [vmem:[%s2569_s12 + $0x30] sm:$0xff]  }
 0x65e   : > { %v1264_v13 = vpop.f32.mrb[18].mxu1  ;;  %v1337_v22 = vsel %vm776_vm4, %v1332_v31, 0  ;;  %v1772_v12 = vld [vmem:[%s2568_s11] ss:$0 sm:$0xff] }
 0x65f   : > { %v1909_v14 = vpop.f32.mrb[19].mxu1  ;;  %v1267_v15 = vsel %vm716_vm3, %v1262_v11, -inf  ;;  %1917 = vmatpush3.bf16.msra.mxu1 %v1337_v22 }
 0x660   : > { %1268 = vmax.xlane.f32.xlu0 %v1267_v15  ;;  %1930 = vmatprep.subr.bf16.mxu1 %v2131_v1 }
 0x6ed   : > { %v1269_v16 = vpop.xlane.xlu0 %1268 }
 0x6ee   : > { %v1270_v17 = vsub.f32 %v1262_v11, %v1269_v16  ;;  %v2030_v11 = vld [vmem:[%s2569_s12 + $0x38] sm:$0xff]  }
 0x6f0   : > { %v1271_v18 = vmul.f32 1.442695, %v1270_v17 }
 0x6f2   : > { %2043 = vpow2.f32 %v1271_v18 }
 0x6fc   : > { %v2044_v19 = vpop.eup %2043 }
 0x6fd   : > { %v1273_v20 = vsel %vm716_vm3, %v2044_v19, 0.0  ;;  %v1276_v21 = vpack.c.bf16 %v2044_v19, %v2044_v19 }
 0x6fe   : > { %1274 = vadd.xlane.f32.xlu0 %v1273_v20 }
 0x6ff   : > { %1913 = vmatmul.mubr.msk.bf16.vlgmr.msra.gmra.mrb[28].mxu0 %vm716_vm3, %v1276_v21 }
 0x700   : > { %1926 = vmatprep.mubr.msk.bf16.mxu0 %vm2132_vm0, %v2131_v1  ;;  %1923 = vmatpush3.bf16.msra.mxu0 %v2021_v6 }
 0x701   : > { %1924 = vmatprep.subr.bf16.mxu0 %v2131_v1 }
 0x704   : > { %1925 = vmatpush3.bf16.msra.mxu0 %v2022_v55 }
 0x72c   : > { %v1204_v25 = vpop.f32.mrb[24].mxu0 }
 0x72d   : > { %v1210_v26 = vadd.f32 %v1204_v25, %v1161_v23  ;;  %v1902_v27 = vpop.f32.mrb[25].mxu0  ;;  %v1784_v25 = vld [vmem:[%s2570_s13] ss:$0 sm:$0xff] }
 0x72e   : > { %v1207_v24 = vpop.f32.mrb[26].mxu0 }
 0x72f   : > { %1211 = vst.msk [vmem:[#allocation4] sm:$0xff] %vm574_vm1, %v1210_v26  ;;  %v1903_v28 = vpop.f32.mrb[27].mxu0 }
 0x736   : > { %v1330_v38 = vld [vmem:[#allocation4] sm:$0xff] }
 0x78b   : > { %v1275_v29 = vpop.xlane.xlu0 %1274 }
 0x78c   : > { %2045 = vrcp.f32 %v1275_v29 }
 0x796   : > { %v2046_v30 = vpop.eup %2045 }
 0x7d2   : > { %v1322_v32 = vpop.f32.mrb[28].mxu0 }
 0x7d3   : > { %v1329_v33 = vmul.f32 %v2046_v30, %v1322_v32  ;;  %v1914_v34 = vpop.f32.mrb[29].mxu0 }
 0x7d4   : > { %v1325_v35 = vpop.f32.mrb[30].mxu0 }
 0x7d5   : > { %v1331_v36 = vpack.c.bf16 %v1329_v33, %v1329_v33  ;;  %v1915_v37 = vpop.f32.mrb[31].mxu0 }
 0x7d7   : > { %1919 = vmatmul.mubr.msk.bf16.vlgmr.msra.gmra.mrb[20].mxu1 %vm716_vm3, %v1331_v36 }
 0x7d8   : > { %1946 = vmatprep.mubr.msk.bf16.mxu1 %vm2132_vm0, %v2131_v1  ;;  %1931 = vmatpush3.bf16.msra.mxu1 %v2023_v56 }
 0x7d9   : > { %1932 = vmatprep.subr.bf16.mxu1 %v2131_v1 }
 0x7dc   : > { %1933 = vmatpush3.bf16.msra.mxu1 %v2024_v57 }
 0x7dd   : > { %1934 = vmatprep.subr.bf16.mxu1 %v2131_v1 }
 0x7e0   : > { %1935 = vmatpush3.bf16.msra.mxu1 %v2025_v58 }
 0x7e1   : > { %1936 = vmatprep.subr.bf16.mxu1 %v2131_v1 }
 0x7e4   : > { %1937 = vmatpush3.bf16.msra.mxu1 %v2026_v59 }
 0x7e5   : > { %1938 = vmatprep.subr.bf16.mxu1 %v2131_v1 }
 0x7e8   : > { %1939 = vmatpush3.bf16.msra.mxu1 %v2027_v60 }
 0x7e9   : > { %1940 = vmatprep.subr.bf16.mxu1 %v2131_v1 }
 0x7ec   : > { %1941 = vmatpush3.bf16.msra.mxu1 %v2028_v61 }
 0x7ed   : > { %1942 = vmatprep.subr.bf16.mxu1 %v2131_v1 }
 0x7f0   : > { %1943 = vmatpush3.bf16.msra.mxu1 %v2029_v10 }
 0x7f1   : > { %1944 = vmatprep.subr.bf16.mxu1 %v2131_v1 }
 0x7f4   : > { %1945 = vmatpush3.bf16.msra.mxu1 %v2030_v11 }
 0x8aa   : > { %v1373_v39 = vpop.f32.mrb[20].mxu1 }
 0x8ab   : > { %v1379_v40 = vadd.f32 %v1373_v39, %v1330_v38  ;;  %v1920_v41 = vpop.f32.mrb[21].mxu1  ;;  %v1785_v39 = vld [vmem:[%s2571_s14] ss:$0 sm:$0xff] }
 0x8ac   : > { %v1376_v42 = vpop.f32.mrb[22].mxu1  ;;  %v1786_v41 = vld [vmem:[%s2572_s15] ss:$0 sm:$0xff] }
 0x8ad   : > { %1380 = vst.msk [vmem:[#allocation4] sm:$0xff] %vm574_vm1, %v1379_v40  ;;  %v1921_v43 = vpop.f32.mrb[23].mxu1 }
 0x8b4   : > { %v1381_v46 = vld [vmem:[#allocation4] sm:$0xff] }
 0x8b5   : > { %v1389_v47 = vadd.f32 %v1769_v44, %v1381_v46  ;;  %1422 = vst.msk [vmem:[#allocation4] sm:$0xff] %vm574_vm1, %v2131_v1 }
 0x8b7   : > { %v1390_v48 = vadd.f32 %v1389_v47, %v634_v45 }
 0x8b9   : > { %v1391_v49 = vsel %vm574_vm1, %v1390_v48, 0.0 }
 0x8ba   : > { %1392 = vadd.xlane.f32.xlu0 %v1391_v49 }
 0x8bc   : > { %v1491_v20 = vld [vmem:[#allocation4] sm:$0xff] }
 0x947   : > { %v1393_v50 = vpop.xlane.xlu0 %1392 }
 0x948   : > { %v1395_v51 = vmul.f32 0.03125, %v1393_v50 }
 0x94a   : > { %v1396_v52 = vsub.f32 %v1390_v48, %v1395_v51 }
 0x94c   : > { %v1397_v53 = vmul.f32 %v1396_v52, %v1396_v52 }
 0x94e   : > { %v1398_v54 = vsel %vm574_vm1, %v1397_v53, 0.0 }
 0x94f   : > { %1399 = vadd.xlane.f32.xlu0 %v1398_v54 }
 0x9dc   : > { %v1400_v62 = vpop.xlane.xlu0 %1399 }
 0x9dd   : > { %v1401_v63 = vmul.f32 0.03125, %v1400_v62 }
 0x9df   : > { %v1402_v0 = vadd.f32 1e-05, %v1401_v63 }
 0x9e1   : > { %2047 = vrsqrt.f32 %v1402_v0 }
 0x9eb   : > { %v2048_v2 = vpop.eup %2047 }
 0x9ec   : > { %v1404_v4 = vmul.f32 %v2048_v2, %v1396_v52 }
 0x9ee   : > { %v1412_v7 = vmul.f32 %v1770_v3, %v1404_v4 }
 0x9f0   : > { %v1420_v8 = vadd.f32 %v1771_v5, %v1412_v7 }
 0x9f2   : > { %v1421_v9 = vpack.c.bf16 %v1420_v8, %v1420_v8 }
 0x9f4   : > { %1927 = vmatmul.mubr.msk.bf16.vlgmr.msra.gmra.mrb[32].mxu0 %vm574_vm1, %v1421_v9 }
 0xac7   : > { %v1483_v13 = vpop.f32.mrb[32].mxu0 }
 0xac8   : > { %v1484_v14 = vadd.f32 %v1772_v12, %v1483_v13  ;;  %v1928_v15 = vpop.f32.mrb[33].mxu0 }
 0xac9   : > { %v1486_v16 = vpop.f32.mrb[34].mxu0 }
 0xaca   : > { %v1489_v17 = vmax.f32 %v1484_v14, 0.0  ;;  %v1929_v18 = vpop.f32.mrb[35].mxu0 }
 0xacc   : > { %v1490_v19 = vpack.c.bf16 %v1489_v17, %v1489_v17 }
 0xace   : > { %1947 = vmatmul.mubr.bf16.vlgmr.msra.gmra.mrb[24].mxu1 %v1490_v19 }
 0xba1   : > { %v1590_v21 = vpop.f32.mrb[24].mxu1 }
 0xba2   : > { %v1596_v1 = vadd.f32 %v1590_v21, %v1491_v20  ;;  %v1948_v31 = vpop.f32.mrb[25].mxu1 }
 0xba3   : > { %v1593_v22 = vpop.f32.mrb[26].mxu1 }
 0xba4   : > { %1597 = vst.msk [vmem:[#allocation4] sm:$0xff] %vm574_vm1, %v1596_v1  ;;  %v1949_v23 = vpop.f32.mrb[27].mxu1 }
 0xbab   : > { %v1598_v26 = vld [vmem:[#allocation4] sm:$0xff] }
 0xbac   : > { %v1606_v27 = vadd.f32 %v1784_v25, %v1598_v26 }
 0xbae   : > { %v1607_v24 = vadd.f32 %v1606_v27, %v1420_v8 }
 0xbb0   : > { %v1608_v28 = vsel %vm574_vm1, %v1607_v24, 0.0 }
 0xbb1   : > { %1609 = vadd.xlane.f32.xlu0 %v1608_v28 }
 0xc3e   : > { %v1610_v29 = vpop.xlane.xlu0 %1609 }
 0xc3f   : > { %v1611_v30 = vmul.f32 0.03125, %v1610_v29 }
 0xc41   : > { %v1612_v32 = vsub.f32 %v1607_v24, %v1611_v30 }
 0xc43   : > { %v1613_v33 = vmul.f32 %v1612_v32, %v1612_v32 }
 0xc45   : > { %v1614_v34 = vsel %vm574_vm1, %v1613_v33, 0.0 }
 0xc46   : > { %1615 = vadd.xlane.f32.xlu1 %v1614_v34 }
 0xcd3   : > { %v1616_v35 = vpop.xlane.xlu1 %1615 }
 0xcd4   : > { %v1617_v36 = vmul.f32 0.03125, %v1616_v35 }
 0xcd6   : > { %v1618_v37 = vadd.f32 1e-05, %v1617_v36 }
 0xcd8   : > { %2049 = vrsqrt.f32 %v1618_v37 }
 0xce2   : > { %v2050_v38 = vpop.eup %2049 }
 0xce3   : > { %v1620_v40 = vmul.f32 %v2050_v38, %v1612_v32 }
 0xce5   : > { %v1628_v42 = vmul.f32 %v1785_v39, %v1620_v40 }
 0xce7   : > { %v1636_v43 = vadd.f32 %v1786_v41, %v1628_v42 }
 0xce9   : > { %v1637_v44 = vpack.c.bf16 %v1636_v43, %v1636_v43 }
 0xceb   : > { %1639 = vst.msk [vmem:[%s537_s27] sm:$0xf] %vm619_vm2, %v1637_v44 }
 0xcec   : > { %2064 = shalt.err (!%p2061_p5)
}
 0xced   : > { %s2065_s1 = scalar_lea.hbm %s2509_s2, 64  ;;  %s2069_s20 = scalar_lea.hbm %s2573_s16, 128 }
 0xcee   : > { %p2066_p6 = scmp.ne.s32.totalorder %s2509_s2, %s2065_s1  ;;  %p2070_p10 = scmp.lt.u32.totalorder %s2509_s2, %s2573_s16 }
 0xcef   : > { %p2071_p11 = scmp.lt.u32.totalorder %s2069_s20, %s2065_s1  ;;  %p2073_p13 = scmp.lt.u32.totalorder %s2065_s1, %s2509_s2 }
 0xcf0   : > { %p2067_p7 = pnand %p2066_p6, %p2263_p4 }
 0xcf1   : > { %p2072_p12 = por %p2071_p11, %p2070_p10 }
 0xcf2   : > { %p2068_p9 = pneg %p2067_p7 }
 0xcf3   : > { %p2074_p0 = por %p2073_p13, %p2072_p12 }
 0xcf5   : > { %p2075_p1 = pnand %p2074_p0, %p2068_p9 }
 0xcf7   : > { %2078 = shalt.err (!%p2075_p1)
}
 0xcf8   : > { %1950 = dma.vmem_to_hbm [thread:$0]  (%p2263_p4), %s2511_s28, 64, %s2509_s2, %s1641_s29  }
 0xcf9 PF: > { %p1956_p2 = scmp.ge.s32.totalorder %s2129_s26, 2  ;;  %s1667_s23 = sand.u32 1, %s2109_s21  }
 0xcfa   : > { %s1668_s24 = scalar_lea.sflag [#allocation6], %s1667_s23 }
 0xcfb   : > { %p1953_p3 = pnand %p1956_p2, %p2270_p8 }
 0xcfd   : > { %2104 = dma.done.wait (!%p1953_p3), %s1668_s24, 64  }
 0xcfe   : > { %2106 = vsyncadd (!%p1953_p3), %s1668_s24, 4294967232  ;;  %s29_s26 = sadd.s32 1, %s2129_s26   ;;  %s2591_s4 = sld [smem:[#allocation8_spill]] }
 0xcff   : > { %p26_p5 = scmp.ge.s32.totalorder %s29_s26, 4   ;;  %s2592_s23 = sld [smem:[#allocation11_spill]] }
 0xd00   : > { %s2593_s24 = sld [smem:[#allocation9_spill]]  ;;  %s2594_s25 = sld [smem:[#allocation10_spill]] }
 0xd01   : > { %s2595_s21 = smov %s2113_s22  ;;  %28 = sbr.rel (!%p26_p5) target bundleno = 9 (0x9), region = 127 }
 0xd04   : > { %s2596_s22 = smov %s2591_s4 }
 0xd08   :  { %1673 = vsyncpa [#allocation6], 1 }
 0xd09   :  { %1675 = vsyncpa [#allocation6 + $0x1], 1 }

</bundles_post_ra>
